<compile_context>
chip_gen: v6e
topology: v6e:2x2x1
jax: 0.10.0
libtpu: 0.0.40
codegen_flags: <defaults>
</compile_context>

<pallas_src>
import jax
import jax.numpy as jnp
from jax import lax
from jax.experimental import pallas as pl
from jax.experimental.pallas import tpu as pltpu

TEND = 1.0
STEP_SIZE = 0.5
N_STEPS = int(round(TEND / STEP_SIZE))   # 2 fixed RK4 steps

LANE = 128
SUBLANE = 8
MAX_BT = 256                             # rows per batch tile (cap)


def _round_up(n, m):
    return ((n + m - 1) // m) * m


def _cdiv(a, b):
    return -(-a // b)


def _choose_batch_tiling(B):
    """Pick (padded batch, batch tile) with (8,)-aligned even tile split.

    >=2 tiles whenever the padded batch is >=16 so the parallel grid axis can
    use both TensorCores on v7x; tiles capped at MAX_BT rows so the serial
    grid loop on v5e/v6e amortizes its per-step overhead.
    """
    Bp = _round_up(B, SUBLANE)
    if Bp >= 2 * SUBLANE:
        n_tiles = max(2, _cdiv(Bp, MAX_BT))
    else:
        n_tiles = 1
    bt = _round_up(_cdiv(Bp, n_tiles), SUBLANE)
    return n_tiles * bt, bt


# ---------------------------------------------------------------------------
# Kernel: integrate dx/dt = tanh(x@W1+b1)@W2+b2 with RK4 (3/8 rule), 2 steps.
# ---------------------------------------------------------------------------
def _rk4_mlp_kernel(x_ref, w1_ref, b1_ref, w2_ref, b2_ref, o_ref):
    def odef(x):
        # Weight loads at each call site: VMEM loads are cheap (3 vld slots,
        # plenty of slack under the f32 MXU multi-pass) and this keeps the
        # vreg file free for the RK4 state instead of pinning 2x[128,128] f32.
        h = jnp.tanh(
            jnp.dot(x, w1_ref[...], preferred_element_type=jnp.float32)
            + b1_ref[...])                      # [1,Hp] sublane-broadcast add
        return (jnp.dot(h, w2_ref[...], preferred_element_type=jnp.float32)
                + b2_ref[...])                  # [1,Dp] sublane-broadcast add

    # Folded scalar constants (scalar * vreg multiplies).
    dt = jnp.float32(STEP_SIZE)
    dt_3 = jnp.float32(STEP_SIZE / 3.0)
    dt_8 = jnp.float32(STEP_SIZE * 0.125)

    def rk4_step(_, x):
        # torchdiffeq 'rk4' = 3/8-rule variant (rk4_alt_step_func), written in
        # running-accumulator form: only x, acc, s and the in-flight k stay
        # live (~3 [BT,128] states) instead of x + k1 + k2 + k3.
        k1 = odef(x)
        k2 = odef(x + k1 * dt_3)
        arg3 = x + k2 * dt - k1 * dt_3
        s = k1 - k2                       # needed for arg4
        acc = k1 + 3.0 * k2               # running weighted sum
        k3 = odef(arg3)
        arg4 = x + (s + k3) * dt
        acc = acc + 3.0 * k3
        k4 = odef(arg4)
        return x + (acc + k4) * dt_8

    o_ref[...] = lax.fori_loop(0, N_STEPS, rk4_step, x_ref[...], unroll=True)


# ---------------------------------------------------------------------------
# Wrapper
# ---------------------------------------------------------------------------
def _pad_params(w1, b1, w2, b2):
    """Pad parameters to lane-aligned shapes. Call ONCE, outside the hot path.

    Zero padding is numerically exact: tanh(0)=0, padded W2 rows / bias
    columns are 0, so padded feature columns stay identically zero.
    """
    w1 = jnp.asarray(w1, jnp.float32)
    w2 = jnp.asarray(w2, jnp.float32)
    b1 = jnp.asarray(b1, jnp.float32).reshape(1, -1)
    b2 = jnp.asarray(b2, jnp.float32).reshape(1, -1)
    D, H = w1.shape
    Dp, Hp = _round_up(D, LANE), _round_up(H, LANE)
    w1p = jnp.zeros((Dp, Hp), jnp.float32).at[:D, :H].set(w1)
    b1p = jnp.zeros((1, Hp), jnp.float32).at[:, :H].set(b1)
    w2p = jnp.zeros((Hp, Dp), jnp.float32).at[:H, :D].set(w2)
    b2p = jnp.zeros((1, Dp), jnp.float32).at[:, :D].set(b2)
    return w1p, b1p, w2p, b2p


def diffeo_forward(x, padded_params):
    """ODE solution at t=Tend (element [1] of odeint's output)."""
    w1p, b1p, w2p, b2p = padded_params
    B, D = x.shape
    Dp = w1p.shape[0]
    Hp = w1p.shape[1]
    Bp, BT = _choose_batch_tiling(B)

    xp = jnp.zeros((Bp, Dp), jnp.float32).at[:B, :D].set(
        x.astype(jnp.float32))

    out = pl.pallas_call(
        _rk4_mlp_kernel,
        out_shape=jax.ShapeDtypeStruct((Bp, Dp), jnp.float32),
        grid=(Bp // BT,),
        in_specs=[
            pl.BlockSpec((BT, Dp), lambda i: (i, 0)),
            # Constant index_maps: weights/biases DMA'd once, VMEM-resident.
            pl.BlockSpec((Dp, Hp), lambda i: (0, 0)),
            pl.BlockSpec((1, Hp), lambda i: (0, 0)),
            pl.BlockSpec((Hp, Dp), lambda i: (0, 0)),
            pl.BlockSpec((1, Dp), lambda i: (0, 0)),
        ],
        out_specs=pl.BlockSpec((BT, Dp), lambda i: (i, 0)),
        # Padded x buffer is a temp; reuse it for the padded output.
        input_output_aliases={0: 0},
        compiler_params=pltpu.CompilerParams(
            dimension_semantics=("parallel",)),
    )(xp, w1p, b1p, w2p, b2p)

    return out[:B, :D]


# ---------------------------------------------------------------------------
# Pure-JAX reference (HIGHEST precision so the 1e-5 check is not flaky).
# ---------------------------------------------------------------------------
def _reference(x, w1, b1, w2, b2):
    hi = lax.Precision.HIGHEST

    def odef(x):
        h = jnp.tanh(jnp.dot(x, w1, precision=hi) + jnp.reshape(b1, (1, -1)))
        return jnp.dot(h, w2, precision=hi) + jnp.reshape(b2, (1, -1))

    dt = STEP_SIZE
    for _ in range(N_STEPS):
        k1 = odef(x)
        k2 = odef(x + dt * k1 / 3.0)
        k3 = odef(x + dt * (k2 - k1 / 3.0))
        k4 = odef(x + dt * (k1 - k2 + k3))
        x = x + (k1 + 3.0 * (k2 + k3) + k4) * dt * 0.125
    return x


if __name__ == "__main__":
    key = jax.random.PRNGKey(0)
    kx, k1, k2, k3, k4 = jax.random.split(key, 5)

    B, D, H = 8, 32, 64   # small batch / feature / hidden sizes
    x = jax.random.normal(kx, (B, D), dtype=jnp.float32)
    # Deterministic synthetic parameters (scaled so dynamics stay tame).
    # TODO(synk): `odef` is undefined in the PyTorch snippet; a tanh-MLP
    # autonomous field is assumed here.
    w1 = 0.1 * jax.random.normal(k1, (D, H), dtype=jnp.float32)
    b1 = 0.1 * jax.random.normal(k2, (H,), dtype=jnp.float32)
    w2 = 0.1 * jax.random.normal(k3, (H, D), dtype=jnp.float32)
    b2 = 0.1 * jax.random.normal(k4, (D,), dtype=jnp.float32)

    # Pad parameters ONCE (outside the per-call path).
    padded = jax.block_until_ready(_pad_params(w1, b1, w2, b2))

    fwd = jax.jit(diffeo_forward)
    out = jax.block_until_ready(fwd(x, padded))

    ref = _reference(x, w1, b1, w2, b2)
    assert out.shape == (B, D)
    assert jnp.allclose(out, ref, atol=1e-5, rtol=1e-5)

    print("KERNEL_OK")
</pallas_src>

<mosaic_0001>
module attributes {stable_mosaic.version = 11 : i64} {
  func.func @_rk4_mlp_kernel(%arg0: i32, %arg1: memref<8x128xf32, #tpu.memory_space<vmem>>, %arg2: memref<128x128xf32, #tpu.memory_space<vmem>>, %arg3: memref<1x128xf32, #tpu.memory_space<vmem>>, %arg4: memref<128x128xf32, #tpu.memory_space<vmem>>, %arg5: memref<1x128xf32, #tpu.memory_space<vmem>>, %arg6: memref<8x128xf32, #tpu.memory_space<vmem>>) attributes {dimension_semantics = [#tpu.dimension_semantics<parallel>], iteration_bounds = array<i64: 1>, scalar_prefetch = 0 : i64, scratch_operands = 0 : i64, tpu.core_type = #tpu.core_type<tc>, window_params = [{transform_indices = @transform_0, window_bounds = array<i64: 8, 128>}, {pipeline_mode = #tpu.pipeline_mode<synchronous>, transform_indices = @transform_1, window_bounds = array<i64: 128, 128>}, {pipeline_mode = #tpu.pipeline_mode<synchronous>, transform_indices = @transform_2, window_bounds = array<i64: 1, 128>}, {pipeline_mode = #tpu.pipeline_mode<synchronous>, transform_indices = @transform_3, window_bounds = array<i64: 128, 128>}, {pipeline_mode = #tpu.pipeline_mode<synchronous>, transform_indices = @transform_4, window_bounds = array<i64: 1, 128>}, {transform_indices = @transform_5, window_bounds = array<i64: 8, 128>}]} {
    %c0 = arith.constant 0 : index
    %c0_0 = arith.constant 0 : index
    %0 = vector.load %arg1[%c0, %c0_0] : memref<8x128xf32, #tpu.memory_space<vmem>>, vector<8x128xf32>
    %cst = arith.constant 0.166666672 : f32
    %cst_1 = arith.constant 5.000000e-01 : f32
    %cst_2 = arith.constant 6.250000e-02 : f32
    %c0_i32 = arith.constant 0 : i32
    %c0_3 = arith.constant 0 : index
    %c0_4 = arith.constant 0 : index
    %1 = vector.load %arg2[%c0_3, %c0_4] : memref<128x128xf32, #tpu.memory_space<vmem>>, vector<128x128xf32>
    %cst_5 = arith.constant dense<0.000000e+00> : vector<8x128xf32>
    %2 = tpu.matmul %0, %1, %cst_5 {dimension_numbers = #tpu.dot_dimension_numbers<[1], [0], [0], [1], [0, 0, 1, 1], [], []>} : vector<8x128xf32>, vector<128x128xf32>, vector<8x128xf32> -> vector<8x128xf32>
    %c0_6 = arith.constant 0 : index
    %c0_7 = arith.constant 0 : index
    %3 = vector.load %arg3[%c0_6, %c0_7] : memref<1x128xf32, #tpu.memory_space<vmem>>, vector<1x128xf32>
    %4 = vector.broadcast %3 : vector<1x128xf32> to vector<8x128xf32>
    %5 = arith.addf %2, %4 : vector<8x128xf32>
    %6 = math.tanh %5 : vector<8x128xf32>
    %c0_8 = arith.constant 0 : index
    %c0_9 = arith.constant 0 : index
    %7 = vector.load %arg4[%c0_8, %c0_9] : memref<128x128xf32, #tpu.memory_space<vmem>>, vector<128x128xf32>
    %cst_10 = arith.constant dense<0.000000e+00> : vector<8x128xf32>
    %8 = tpu.matmul %6, %7, %cst_10 {dimension_numbers = #tpu.dot_dimension_numbers<[1], [0], [0], [1], [0, 0, 1, 1], [], []>} : vector<8x128xf32>, vector<128x128xf32>, vector<8x128xf32> -> vector<8x128xf32>
    %c0_11 = arith.constant 0 : index
    %c0_12 = arith.constant 0 : index
    %9 = vector.load %arg5[%c0_11, %c0_12] : memref<1x128xf32, #tpu.memory_space<vmem>>, vector<1x128xf32>
    %10 = vector.broadcast %9 : vector<1x128xf32> to vector<8x128xf32>
    %11 = arith.addf %8, %10 : vector<8x128xf32>
    %12 = vector.broadcast %cst : f32 to vector<8x128xf32>
    %13 = arith.mulf %11, %12 : vector<8x128xf32>
    %14 = arith.addf %0, %13 : vector<8x128xf32>
    %c0_13 = arith.constant 0 : index
    %c0_14 = arith.constant 0 : index
    %15 = vector.load %arg2[%c0_13, %c0_14] : memref<128x128xf32, #tpu.memory_space<vmem>>, vector<128x128xf32>
    %cst_15 = arith.constant dense<0.000000e+00> : vector<8x128xf32>
    %16 = tpu.matmul %14, %15, %cst_15 {dimension_numbers = #tpu.dot_dimension_numbers<[1], [0], [0], [1], [0, 0, 1, 1], [], []>} : vector<8x128xf32>, vector<128x128xf32>, vector<8x128xf32> -> vector<8x128xf32>
    %c0_16 = arith.constant 0 : index
    %c0_17 = arith.constant 0 : index
    %17 = vector.load %arg3[%c0_16, %c0_17] : memref<1x128xf32, #tpu.memory_space<vmem>>, vector<1x128xf32>
    %18 = vector.broadcast %17 : vector<1x128xf32> to vector<8x128xf32>
    %19 = arith.addf %16, %18 : vector<8x128xf32>
    %20 = math.tanh %19 : vector<8x128xf32>
    %c0_18 = arith.constant 0 : index
    %c0_19 = arith.constant 0 : index
    %21 = vector.load %arg4[%c0_18, %c0_19] : memref<128x128xf32, #tpu.memory_space<vmem>>, vector<128x128xf32>
    %cst_20 = arith.constant dense<0.000000e+00> : vector<8x128xf32>
    %22 = tpu.matmul %20, %21, %cst_20 {dimension_numbers = #tpu.dot_dimension_numbers<[1], [0], [0], [1], [0, 0, 1, 1], [], []>} : vector<8x128xf32>, vector<128x128xf32>, vector<8x128xf32> -> vector<8x128xf32>
    %c0_21 = arith.constant 0 : index
    %c0_22 = arith.constant 0 : index
    %23 = vector.load %arg5[%c0_21, %c0_22] : memref<1x128xf32, #tpu.memory_space<vmem>>, vector<1x128xf32>
    %24 = vector.broadcast %23 : vector<1x128xf32> to vector<8x128xf32>
    %25 = arith.addf %22, %24 : vector<8x128xf32>
    %26 = vector.broadcast %cst_1 : f32 to vector<8x128xf32>
    %27 = arith.mulf %25, %26 : vector<8x128xf32>
    %28 = arith.addf %0, %27 : vector<8x128xf32>
    %29 = vector.broadcast %cst : f32 to vector<8x128xf32>
    %30 = arith.mulf %11, %29 : vector<8x128xf32>
    %31 = arith.subf %28, %30 : vector<8x128xf32>
    %32 = arith.subf %11, %25 : vector<8x128xf32>
    %cst_23 = arith.constant 3.000000e+00 : f32
    %33 = vector.broadcast %cst_23 : f32 to vector<8x128xf32>
    %34 = arith.mulf %33, %25 : vector<8x128xf32>
    %35 = arith.addf %11, %34 : vector<8x128xf32>
    %c0_24 = arith.constant 0 : index
    %c0_25 = arith.constant 0 : index
    %36 = vector.load %arg2[%c0_24, %c0_25] : memref<128x128xf32, #tpu.memory_space<vmem>>, vector<128x128xf32>
    %cst_26 = arith.constant dense<0.000000e+00> : vector<8x128xf32>
    %37 = tpu.matmul %31, %36, %cst_26 {dimension_numbers = #tpu.dot_dimension_numbers<[1], [0], [0], [1], [0, 0, 1, 1], [], []>} : vector<8x128xf32>, vector<128x128xf32>, vector<8x128xf32> -> vector<8x128xf32>
    %c0_27 = arith.constant 0 : index
    %c0_28 = arith.constant 0 : index
    %38 = vector.load %arg3[%c0_27, %c0_28] : memref<1x128xf32, #tpu.memory_space<vmem>>, vector<1x128xf32>
    %39 = vector.broadcast %38 : vector<1x128xf32> to vector<8x128xf32>
    %40 = arith.addf %37, %39 : vector<8x128xf32>
    %41 = math.tanh %40 : vector<8x128xf32>
    %c0_29 = arith.constant 0 : index
    %c0_30 = arith.constant 0 : index
    %42 = vector.load %arg4[%c0_29, %c0_30] : memref<128x128xf32, #tpu.memory_space<vmem>>, vector<128x128xf32>
    %cst_31 = arith.constant dense<0.000000e+00> : vector<8x128xf32>
    %43 = tpu.matmul %41, %42, %cst_31 {dimension_numbers = #tpu.dot_dimension_numbers<[1], [0], [0], [1], [0, 0, 1, 1], [], []>} : vector<8x128xf32>, vector<128x128xf32>, vector<8x128xf32> -> vector<8x128xf32>
    %c0_32 = arith.constant 0 : index
    %c0_33 = arith.constant 0 : index
    %44 = vector.load %arg5[%c0_32, %c0_33] : memref<1x128xf32, #tpu.memory_space<vmem>>, vector<1x128xf32>
    %45 = vector.broadcast %44 : vector<1x128xf32> to vector<8x128xf32>
    %46 = arith.addf %43, %45 : vector<8x128xf32>
    %47 = arith.addf %32, %46 : vector<8x128xf32>
    %48 = vector.broadcast %cst_1 : f32 to vector<8x128xf32>
    %49 = arith.mulf %47, %48 : vector<8x128xf32>
    %50 = arith.addf %0, %49 : vector<8x128xf32>
    %cst_34 = arith.constant 3.000000e+00 : f32
    %51 = vector.broadcast %cst_34 : f32 to vector<8x128xf32>
    %52 = arith.mulf %51, %46 : vector<8x128xf32>
    %53 = arith.addf %35, %52 : vector<8x128xf32>
    %c0_35 = arith.constant 0 : index
    %c0_36 = arith.constant 0 : index
    %54 = vector.load %arg2[%c0_35, %c0_36] : memref<128x128xf32, #tpu.memory_space<vmem>>, vector<128x128xf32>
    %cst_37 = arith.constant dense<0.000000e+00> : vector<8x128xf32>
    %55 = tpu.matmul %50, %54, %cst_37 {dimension_numbers = #tpu.dot_dimension_numbers<[1], [0], [0], [1], [0, 0, 1, 1], [], []>} : vector<8x128xf32>, vector<128x128xf32>, vector<8x128xf32> -> vector<8x128xf32>
    %c0_38 = arith.constant 0 : index
    %c0_39 = arith.constant 0 : index
    %56 = vector.load %arg3[%c0_38, %c0_39] : memref<1x128xf32, #tpu.memory_space<vmem>>, vector<1x128xf32>
    %57 = vector.broadcast %56 : vector<1x128xf32> to vector<8x128xf32>
    %58 = arith.addf %55, %57 : vector<8x128xf32>
    %59 = math.tanh %58 : vector<8x128xf32>
    %c0_40 = arith.constant 0 : index
    %c0_41 = arith.constant 0 : index
    %60 = vector.load %arg4[%c0_40, %c0_41] : memref<128x128xf32, #tpu.memory_space<vmem>>, vector<128x128xf32>
    %cst_42 = arith.constant dense<0.000000e+00> : vector<8x128xf32>
    %61 = tpu.matmul %59, %60, %cst_42 {dimension_numbers = #tpu.dot_dimension_numbers<[1], [0], [0], [1], [0, 0, 1, 1], [], []>} : vector<8x128xf32>, vector<128x128xf32>, vector<8x128xf32> -> vector<8x128xf32>
    %c0_43 = arith.constant 0 : index
    %c0_44 = arith.constant 0 : index
    %62 = vector.load %arg5[%c0_43, %c0_44] : memref<1x128xf32, #tpu.memory_space<vmem>>, vector<1x128xf32>
    %63 = vector.broadcast %62 : vector<1x128xf32> to vector<8x128xf32>
    %64 = arith.addf %61, %63 : vector<8x128xf32>
    %65 = arith.addf %53, %64 : vector<8x128xf32>
    %66 = vector.broadcast %cst_2 : f32 to vector<8x128xf32>
    %67 = arith.mulf %65, %66 : vector<8x128xf32>
    %68 = arith.addf %0, %67 : vector<8x128xf32>
    %c1_i32 = arith.constant 1 : i32
    %c0_45 = arith.constant 0 : index
    %c0_46 = arith.constant 0 : index
    %69 = vector.load %arg2[%c0_45, %c0_46] : memref<128x128xf32, #tpu.memory_space<vmem>>, vector<128x128xf32>
    %cst_47 = arith.constant dense<0.000000e+00> : vector<8x128xf32>
    %70 = tpu.matmul %68, %69, %cst_47 {dimension_numbers = #tpu.dot_dimension_numbers<[1], [0], [0], [1], [0, 0, 1, 1], [], []>} : vector<8x128xf32>, vector<128x128xf32>, vector<8x128xf32> -> vector<8x128xf32>
    %c0_48 = arith.constant 0 : index
    %c0_49 = arith.constant 0 : index
    %71 = vector.load %arg3[%c0_48, %c0_49] : memref<1x128xf32, #tpu.memory_space<vmem>>, vector<1x128xf32>
    %72 = vector.broadcast %71 : vector<1x128xf32> to vector<8x128xf32>
    %73 = arith.addf %70, %72 : vector<8x128xf32>
    %74 = math.tanh %73 : vector<8x128xf32>
    %c0_50 = arith.constant 0 : index
    %c0_51 = arith.constant 0 : index
    %75 = vector.load %arg4[%c0_50, %c0_51] : memref<128x128xf32, #tpu.memory_space<vmem>>, vector<128x128xf32>
    %cst_52 = arith.constant dense<0.000000e+00> : vector<8x128xf32>
    %76 = tpu.matmul %74, %75, %cst_52 {dimension_numbers = #tpu.dot_dimension_numbers<[1], [0], [0], [1], [0, 0, 1, 1], [], []>} : vector<8x128xf32>, vector<128x128xf32>, vector<8x128xf32> -> vector<8x128xf32>
    %c0_53 = arith.constant 0 : index
    %c0_54 = arith.constant 0 : index
    %77 = vector.load %arg5[%c0_53, %c0_54] : memref<1x128xf32, #tpu.memory_space<vmem>>, vector<1x128xf32>
    %78 = vector.broadcast %77 : vector<1x128xf32> to vector<8x128xf32>
    %79 = arith.addf %76, %78 : vector<8x128xf32>
    %80 = vector.broadcast %cst : f32 to vector<8x128xf32>
    %81 = arith.mulf %79, %80 : vector<8x128xf32>
    %82 = arith.addf %68, %81 : vector<8x128xf32>
    %c0_55 = arith.constant 0 : index
    %c0_56 = arith.constant 0 : index
    %83 = vector.load %arg2[%c0_55, %c0_56] : memref<128x128xf32, #tpu.memory_space<vmem>>, vector<128x128xf32>
    %cst_57 = arith.constant dense<0.000000e+00> : vector<8x128xf32>
    %84 = tpu.matmul %82, %83, %cst_57 {dimension_numbers = #tpu.dot_dimension_numbers<[1], [0], [0], [1], [0, 0, 1, 1], [], []>} : vector<8x128xf32>, vector<128x128xf32>, vector<8x128xf32> -> vector<8x128xf32>
    %c0_58 = arith.constant 0 : index
    %c0_59 = arith.constant 0 : index
    %85 = vector.load %arg3[%c0_58, %c0_59] : memref<1x128xf32, #tpu.memory_space<vmem>>, vector<1x128xf32>
    %86 = vector.broadcast %85 : vector<1x128xf32> to vector<8x128xf32>
    %87 = arith.addf %84, %86 : vector<8x128xf32>
    %88 = math.tanh %87 : vector<8x128xf32>
    %c0_60 = arith.constant 0 : index
    %c0_61 = arith.constant 0 : index
    %89 = vector.load %arg4[%c0_60, %c0_61] : memref<128x128xf32, #tpu.memory_space<vmem>>, vector<128x128xf32>
    %cst_62 = arith.constant dense<0.000000e+00> : vector<8x128xf32>
    %90 = tpu.matmul %88, %89, %cst_62 {dimension_numbers = #tpu.dot_dimension_numbers<[1], [0], [0], [1], [0, 0, 1, 1], [], []>} : vector<8x128xf32>, vector<128x128xf32>, vector<8x128xf32> -> vector<8x128xf32>
    %c0_63 = arith.constant 0 : index
    %c0_64 = arith.constant 0 : index
    %91 = vector.load %arg5[%c0_63, %c0_64] : memref<1x128xf32, #tpu.memory_space<vmem>>, vector<1x128xf32>
    %92 = vector.broadcast %91 : vector<1x128xf32> to vector<8x128xf32>
    %93 = arith.addf %90, %92 : vector<8x128xf32>
    %94 = vector.broadcast %cst_1 : f32 to vector<8x128xf32>
    %95 = arith.mulf %93, %94 : vector<8x128xf32>
    %96 = arith.addf %68, %95 : vector<8x128xf32>
    %97 = vector.broadcast %cst : f32 to vector<8x128xf32>
    %98 = arith.mulf %79, %97 : vector<8x128xf32>
    %99 = arith.subf %96, %98 : vector<8x128xf32>
    %100 = arith.subf %79, %93 : vector<8x128xf32>
    %cst_65 = arith.constant 3.000000e+00 : f32
    %101 = vector.broadcast %cst_65 : f32 to vector<8x128xf32>
    %102 = arith.mulf %101, %93 : vector<8x128xf32>
    %103 = arith.addf %79, %102 : vector<8x128xf32>
    %c0_66 = arith.constant 0 : index
    %c0_67 = arith.constant 0 : index
    %104 = vector.load %arg2[%c0_66, %c0_67] : memref<128x128xf32, #tpu.memory_space<vmem>>, vector<128x128xf32>
    %cst_68 = arith.constant dense<0.000000e+00> : vector<8x128xf32>
    %105 = tpu.matmul %99, %104, %cst_68 {dimension_numbers = #tpu.dot_dimension_numbers<[1], [0], [0], [1], [0, 0, 1, 1], [], []>} : vector<8x128xf32>, vector<128x128xf32>, vector<8x128xf32> -> vector<8x128xf32>
    %c0_69 = arith.constant 0 : index
    %c0_70 = arith.constant 0 : index
    %106 = vector.load %arg3[%c0_69, %c0_70] : memref<1x128xf32, #tpu.memory_space<vmem>>, vector<1x128xf32>
    %107 = vector.broadcast %106 : vector<1x128xf32> to vector<8x128xf32>
    %108 = arith.addf %105, %107 : vector<8x128xf32>
    %109 = math.tanh %108 : vector<8x128xf32>
    %c0_71 = arith.constant 0 : index
    %c0_72 = arith.constant 0 : index
    %110 = vector.load %arg4[%c0_71, %c0_72] : memref<128x128xf32, #tpu.memory_space<vmem>>, vector<128x128xf32>
    %cst_73 = arith.constant dense<0.000000e+00> : vector<8x128xf32>
    %111 = tpu.matmul %109, %110, %cst_73 {dimension_numbers = #tpu.dot_dimension_numbers<[1], [0], [0], [1], [0, 0, 1, 1], [], []>} : vector<8x128xf32>, vector<128x128xf32>, vector<8x128xf32> -> vector<8x128xf32>
    %c0_74 = arith.constant 0 : index
    %c0_75 = arith.constant 0 : index
    %112 = vector.load %arg5[%c0_74, %c0_75] : memref<1x128xf32, #tpu.memory_space<vmem>>, vector<1x128xf32>
    %113 = vector.broadcast %112 : vector<1x128xf32> to vector<8x128xf32>
    %114 = arith.addf %111, %113 : vector<8x128xf32>
    %115 = arith.addf %100, %114 : vector<8x128xf32>
    %116 = vector.broadcast %cst_1 : f32 to vector<8x128xf32>
    %117 = arith.mulf %115, %116 : vector<8x128xf32>
    %118 = arith.addf %68, %117 : vector<8x128xf32>
    %cst_76 = arith.constant 3.000000e+00 : f32
    %119 = vector.broadcast %cst_76 : f32 to vector<8x128xf32>
    %120 = arith.mulf %119, %114 : vector<8x128xf32>
    %121 = arith.addf %103, %120 : vector<8x128xf32>
    %c0_77 = arith.constant 0 : index
    %c0_78 = arith.constant 0 : index
    %122 = vector.load %arg2[%c0_77, %c0_78] : memref<128x128xf32, #tpu.memory_space<vmem>>, vector<128x128xf32>
    %cst_79 = arith.constant dense<0.000000e+00> : vector<8x128xf32>
    %123 = tpu.matmul %118, %122, %cst_79 {dimension_numbers = #tpu.dot_dimension_numbers<[1], [0], [0], [1], [0, 0, 1, 1], [], []>} : vector<8x128xf32>, vector<128x128xf32>, vector<8x128xf32> -> vector<8x128xf32>
    %c0_80 = arith.constant 0 : index
    %c0_81 = arith.constant 0 : index
    %124 = vector.load %arg3[%c0_80, %c0_81] : memref<1x128xf32, #tpu.memory_space<vmem>>, vector<1x128xf32>
    %125 = vector.broadcast %124 : vector<1x128xf32> to vector<8x128xf32>
    %126 = arith.addf %123, %125 : vector<8x128xf32>
    %127 = math.tanh %126 : vector<8x128xf32>
    %c0_82 = arith.constant 0 : index
    %c0_83 = arith.constant 0 : index
    %128 = vector.load %arg4[%c0_82, %c0_83] : memref<128x128xf32, #tpu.memory_space<vmem>>, vector<128x128xf32>
    %cst_84 = arith.constant dense<0.000000e+00> : vector<8x128xf32>
    %129 = tpu.matmul %127, %128, %cst_84 {dimension_numbers = #tpu.dot_dimension_numbers<[1], [0], [0], [1], [0, 0, 1, 1], [], []>} : vector<8x128xf32>, vector<128x128xf32>, vector<8x128xf32> -> vector<8x128xf32>
    %c0_85 = arith.constant 0 : index
    %c0_86 = arith.constant 0 : index
    %130 = vector.load %arg5[%c0_85, %c0_86] : memref<1x128xf32, #tpu.memory_space<vmem>>, vector<1x128xf32>
    %131 = vector.broadcast %130 : vector<1x128xf32> to vector<8x128xf32>
    %132 = arith.addf %129, %131 : vector<8x128xf32>
    %133 = arith.addf %121, %132 : vector<8x128xf32>
    %134 = vector.broadcast %cst_2 : f32 to vector<8x128xf32>
    %135 = arith.mulf %133, %134 : vector<8x128xf32>
    %136 = arith.addf %68, %135 : vector<8x128xf32>
    %c0_87 = arith.constant 0 : index
    %c0_88 = arith.constant 0 : index
    %137 = vector.load %arg6[%c0_87, %c0_88] : memref<8x128xf32, #tpu.memory_space<vmem>>, vector<8x128xf32>
    tpu.vector_store %arg6[%c0_87, %c0_88], %136 {strides = array<i32>} : memref<8x128xf32, #tpu.memory_space<vmem>>, vector<8x128xf32>,
    return
  }
  func.func @transform_0(%arg0: i32) -> (i32, i32) {
    %c0_i32 = arith.constant 0 : i32
    %c0_i32_0 = arith.constant 0 : i32
    return %arg0, %c0_i32 : i32, i32
  }
  func.func @transform_1(%arg0: i32) -> (i32, i32) {
    %c0_i32 = arith.constant 0 : i32
    %c0_i32_0 = arith.constant 0 : i32
    %c0_i32_1 = arith.constant 0 : i32
    return %c0_i32, %c0_i32_0 : i32, i32
  }
  func.func @transform_2(%arg0: i32) -> (i32, i32) {
    %c0_i32 = arith.constant 0 : i32
    %c0_i32_0 = arith.constant 0 : i32
    %c0_i32_1 = arith.constant 0 : i32
    return %c0_i32, %c0_i32_0 : i32, i32
  }
  func.func @transform_3(%arg0: i32) -> (i32, i32) {
    %c0_i32 = arith.constant 0 : i32
    %c0_i32_0 = arith.constant 0 : i32
    %c0_i32_1 = arith.constant 0 : i32
    return %c0_i32, %c0_i32_0 : i32, i32
  }
  func.func @transform_4(%arg0: i32) -> (i32, i32) {
    %c0_i32 = arith.constant 0 : i32
    %c0_i32_0 = arith.constant 0 : i32
    %c0_i32_1 = arith.constant 0 : i32
    return %c0_i32, %c0_i32_0 : i32, i32
  }
  func.func @transform_5(%arg0: i32) -> (i32, i32) {
    %c0_i32 = arith.constant 0 : i32
    %c0_i32_0 = arith.constant 0 : i32
    return %arg0, %c0_i32 : i32, i32
  }
}

</mosaic_0001>

<bundles_post_ra>
// kernel: diffeo_forward.1
= control target key start
LH: loop header
LB: loop body
LE: loop exit
PB: predicated region body
PF: predicated region fallthrough
CT: control target
= control target key end

     0   :  { %10 = vsyncpa [#allocation3], 0  ;;  %s2910_s0 = inlined_call_operand.vmem [shape: f32[8,128], index: 0, kind: input, shape index: {}, may-alias: {0,5}]   ;;  %s2911_s1 = inlined_call_operand.hbm [shape: f32[128,128], index: 1, kind: input, shape index: {}]   ;;  %s2912_s2 = inlined_call_operand.vmem [shape: f32[1,128], index: 2, kind: input, shape index: {}]   ;;  %s2913_s3 = inlined_call_operand.hbm [shape: f32[128,128], index: 3, kind: input, shape index: {}]   ;;  %s2914_s4 = inlined_call_operand.vmem [shape: f32[1,128], index: 4, kind: input, shape index: {}]   ;;  %s2915_s5 = inlined_call_operand.vmem [shape: f32[8,128], index: 5, kind: output, shape index: {}, may-alias: {0,5}]  }
   0x1   :  { %11 = vsyncpa [#allocation5], 0  ;;  %s2195_s18 = smov [#allocation2]  }
   0x2   :  { %s19_s19 = sshll.u32 %s2195_s18, 4  ;;  %s20_s19 = int_to_ptr.vmem [resolvable:$true] %s19_s19 }
   0x3   :  { %s2159_s20 = scalar_lea.vmem %s20_s19, 2048  ;;  %p2164_p1 = scmp.lt.s32.totalorder %s20_s19, %s20_s19 }
   0x4   :  { %p2160_p0 = scmp.ne.s32.totalorder %s20_s19, %s2159_s20  ;;  %p2165_p2 = scmp.lt.s32.totalorder %s2159_s20, %s2159_s20 }
   0x6   :  { %p2166_p3 = por %p2165_p2, %p2164_p1 }
   0x8   :  { %p2167_p4 = pnand %p2166_p3, %p2160_p0 }
   0xa   :  { %2170 = shalt.err (!%p2167_p4)
}
   0xb   :  { %s2196_s21 = smov 128   ;;  %s2197_s22 = smov 8  }
   0xc   :  { %25 = dma.hbm_to_vmem [thread:$0]  %s2911_s1, 2048, %s20_s19, [#allocation3], %s2196_s21, %s2196_s21, %s2197_s22  }
   0xd   :  { %s2198_s25 = smov [#allocation4]  }
   0xe   :  { %s33_s26 = sshll.u32 %s2198_s25, 4  ;;  %s34_s26 = int_to_ptr.vmem [resolvable:$true] %s33_s26 }
   0xf   :  { %s2179_s27 = scalar_lea.vmem %s34_s26, 2048  ;;  %p2184_p6 = scmp.lt.s32.totalorder %s34_s26, %s34_s26 }
  0x10   :  { %p2180_p5 = scmp.ne.s32.totalorder %s34_s26, %s2179_s27  ;;  %p2185_p7 = scmp.lt.s32.totalorder %s2179_s27, %s2179_s27 }
  0x12   :  { %p2186_p8 = por %p2185_p7, %p2184_p6 }
  0x14   :  { %p2187_p9 = pnand %p2186_p8, %p2180_p5 }
  0x16   :  { %2190 = shalt.err (!%p2187_p9)
}
  0x17   :  { %39 = dma.hbm_to_vmem [thread:$0]  %s2913_s3, 2048, %s34_s26, [#allocation5], %s2196_s21, %s2196_s21, %s2197_s22  }
  0x18   :  { %2191 = dma.done.wait [#allocation3], 2048  }
  0x19   :  { %2192 = vsyncadd [#allocation3], 4294965248 }
  0x1a   :  { %2193 = dma.done.wait [#allocation5], 2048  }
  0x1b   :  { %2194 = vsyncadd [#allocation5], 4294965248  ;;  %v2199_v0 = vmov 0.0   ;;  %vm2200_vm0 = vmmov 0   ;;  %v2243_v1 = vld [vmem:[#allocation2 + $0x78] sm:$0xff]  ;;  %v2245_v2 = vld [vmem:[#allocation2 + $0x70] sm:$0xff] }
  0x1c   :  { %1536 = vmatprep.subr.mxu0 %v2199_v0  ;;  %1568 = vmatprep.mubr.msk.f32.mxu0 %vm2200_vm0, %v2199_v0  ;;  %v2249_v3 = vld [vmem:[#allocation2 + $0x68] sm:$0xff]  ;;  %v2253_v4 = vld [vmem:[#allocation2 + $0x60] sm:$0xff]  ;;  %v2256_v5 = vld [vmem:[#allocation4 + $0x78] sm:$0xff] }
  0x1d   :  { %1571 = vmatprep.subr.mxu1 %v2199_v0  ;;  %1603 = vmatprep.mubr.msk.f32.mxu1 %vm2200_vm0, %v2199_v0  ;;  %v2259_v6 = vld [vmem:[#allocation2 + $0x58] sm:$0xff]  ;;  %v2262_v7 = vld [vmem:[#allocation4 + $0x70] sm:$0xff]  ;;  %v2266_v8 = vld [vmem:[#allocation4 + $0x68] sm:$0xff] }
  0x1e   :  { %1537 = vmatpush3.msra.mxu0 %v2243_v1  ;;  %1572 = vmatpush3.msra.mxu1 %v2256_v5  ;;  %v2269_v9 = vld [vmem:[#allocation2 + $0x50] sm:$0xff]  ;;  %v2274_v10 = vld [vmem:[#allocation4 + $0x60] sm:$0xff]  ;;  %v2277_v11 = vld [vmem:[#allocation2 + $0x48] sm:$0xff] }
  0x1f   :  { %1538 = vmatprep.subr.mxu0 %v2199_v0  ;;  %1573 = vmatprep.subr.mxu1 %v2199_v0  ;;  %v2282_v12 = vld [vmem:[#allocation4 + $0x58] sm:$0xff]  ;;  %v2285_v13 = vld [vmem:[#allocation2 + $0x40] sm:$0xff]  ;;  %v2290_v14 = vld [vmem:[#allocation4 + $0x50] sm:$0xff] }
  0x20   :  { %1539 = vmatpush3.msra.mxu0 %v2245_v2  ;;  %1574 = vmatpush3.msra.mxu1 %v2262_v7  ;;  %v2293_v15 = vld [vmem:[#allocation2 + $0x38] sm:$0xff]  ;;  %v2298_v16 = vld [vmem:[#allocation4 + $0x48] sm:$0xff]  ;;  %v2301_v17 = vld [vmem:[#allocation2 + $0x30] sm:$0xff] }
  0x21   :  { %1540 = vmatprep.subr.mxu0 %v2199_v0  ;;  %1575 = vmatprep.subr.mxu1 %v2199_v0  ;;  %v2307_v18 = vld [vmem:[#allocation2 + $0x28] sm:$0xff]  ;;  %v2313_v19 = vld [vmem:[#allocation2 + $0x20] sm:$0xff]  ;;  %v2317_v20 = vld [vmem:[#allocation2 + $0x18] sm:$0xff] }
  0x22   :  { %1541 = vmatpush3.msra.mxu0 %v2249_v3  ;;  %1576 = vmatpush3.msra.mxu1 %v2266_v8  ;;  %v2321_v21 = vld [vmem:[#allocation2 + $0x10] sm:$0xff]  ;;  %v2325_v22 = vld [vmem:[#allocation2 + $0x8] sm:$0xff]  ;;  %v2329_v23 = vld [vmem:[#allocation2] sm:$0xff] }
  0x23   :  { %1542 = vmatprep.subr.mxu0 %v2199_v0  ;;  %1577 = vmatprep.subr.mxu1 %v2199_v0  ;;  %v2335_v24 = vld [vmem:[%s2910_s0] sm:$0xff]  ;;  %v2379_v26 = vld [vmem:[#allocation4 + $0x38] sm:$0xff]  ;;  %v2383_v27 = vld [vmem:[#allocation4 + $0x30] sm:$0xff] }
  0x24   :  { %1543 = vmatpush3.msra.mxu0 %v2253_v4  ;;  %1578 = vmatpush3.msra.mxu1 %v2274_v10  ;;  %v2375_v25 = vld [vmem:[#allocation4 + $0x40] sm:$0xff]  ;;  %v2385_v28 = vld [vmem:[#allocation4 + $0x28] sm:$0xff]  ;;  %v2393_v30 = vld [vmem:[#allocation4 + $0x18] sm:$0xff] }
  0x25   :  { %1544 = vmatprep.subr.mxu0 %v2199_v0  ;;  %1579 = vmatprep.subr.mxu1 %v2199_v0  ;;  %v2389_v29 = vld [vmem:[#allocation4 + $0x20] sm:$0xff]  ;;  %v2397_v31 = vld [vmem:[#allocation4 + $0x10] sm:$0xff]  ;;  %v2401_v32 = vld [vmem:[#allocation4 + $0x8] sm:$0xff] }
  0x26   :  { %1545 = vmatpush3.msra.mxu0 %v2259_v6  ;;  %1580 = vmatpush3.msra.mxu1 %v2282_v12  ;;  %v2405_v33 = vld [vmem:[#allocation4] sm:$0xff] }
  0x27   :  { %1546 = vmatprep.subr.mxu0 %v2199_v0  ;;  %1581 = vmatprep.subr.mxu1 %v2199_v0  ;;  %v2414_v34 = vld [vmem:[%s2912_s2] ss:$0 sm:$0xff] }
  0x28   :  { %1547 = vmatpush3.msra.mxu0 %v2269_v9  ;;  %1582 = vmatpush3.msra.mxu1 %v2290_v14  ;;  %v2454_v39 = vld [vmem:[%s2914_s4] ss:$0 sm:$0xff] }
  0x29   :  { %1548 = vmatprep.subr.mxu0 %v2199_v0  ;;  %1583 = vmatprep.subr.mxu1 %v2199_v0 }
  0x2a   :  { %1549 = vmatpush3.msra.mxu0 %v2277_v11  ;;  %1584 = vmatpush3.msra.mxu1 %v2298_v16 }
  0x2b   :  { %1550 = vmatprep.subr.mxu0 %v2199_v0  ;;  %1585 = vmatprep.subr.mxu1 %v2199_v0 }
  0x2c   :  { %1551 = vmatpush3.msra.mxu0 %v2285_v13  ;;  %1586 = vmatpush3.msra.mxu1 %v2375_v25 }
  0x2d   :  { %1552 = vmatprep.subr.mxu0 %v2199_v0  ;;  %1587 = vmatprep.subr.mxu1 %v2199_v0 }
  0x2e   :  { %1553 = vmatpush3.msra.mxu0 %v2293_v15  ;;  %1588 = vmatpush3.msra.mxu1 %v2379_v26 }
  0x2f   :  { %1554 = vmatprep.subr.mxu0 %v2199_v0  ;;  %1589 = vmatprep.subr.mxu1 %v2199_v0 }
  0x30   :  { %1555 = vmatpush3.msra.mxu0 %v2301_v17  ;;  %1590 = vmatpush3.msra.mxu1 %v2383_v27 }
  0x31   :  { %1556 = vmatprep.subr.mxu0 %v2199_v0  ;;  %1591 = vmatprep.subr.mxu1 %v2199_v0 }
  0x32   :  { %1557 = vmatpush3.msra.mxu0 %v2307_v18  ;;  %1592 = vmatpush3.msra.mxu1 %v2385_v28 }
  0x33   :  { %1558 = vmatprep.subr.mxu0 %v2199_v0  ;;  %1593 = vmatprep.subr.mxu1 %v2199_v0 }
  0x34   :  { %1559 = vmatpush3.msra.mxu0 %v2313_v19  ;;  %1594 = vmatpush3.msra.mxu1 %v2389_v29 }
  0x35   :  { %1560 = vmatprep.subr.mxu0 %v2199_v0  ;;  %1595 = vmatprep.subr.mxu1 %v2199_v0 }
  0x36   :  { %1561 = vmatpush3.msra.mxu0 %v2317_v20  ;;  %1596 = vmatpush3.msra.mxu1 %v2393_v30 }
  0x37   :  { %1562 = vmatprep.subr.mxu0 %v2199_v0  ;;  %1597 = vmatprep.subr.mxu1 %v2199_v0 }
  0x38   :  { %1563 = vmatpush3.msra.mxu0 %v2321_v21  ;;  %1598 = vmatpush3.msra.mxu1 %v2397_v31 }
  0x39   :  { %1564 = vmatprep.subr.mxu0 %v2199_v0  ;;  %1599 = vmatprep.subr.mxu1 %v2199_v0 }
  0x3a   :  { %1565 = vmatpush3.msra.mxu0 %v2325_v22  ;;  %1600 = vmatpush3.msra.mxu1 %v2401_v32 }
  0x3b   :  { %1566 = vmatprep.subr.mxu0 %v2199_v0  ;;  %1601 = vmatprep.subr.mxu1 %v2199_v0 }
  0x3c   :  { %1567 = vmatpush3.msra.mxu0 %v2329_v23  ;;  %1602 = vmatpush3.msra.mxu1 %v2405_v33 }
  0x3d   :  { %1569 = vmatmul.mubr.f32.vlgmr.msra.gmra.mxu0 %v2335_v24  ;;  %1606 = vmatprep.subr.mxu0 %v2199_v0 }
  0x3e   :  { %1607 = vmatpush3.msra.mxu0 %v2243_v1  ;;  %1638 = vmatprep.mubr.msk.f32.mxu0 %vm2200_vm0, %v2199_v0 }
  0x3f   :  { %1608 = vmatprep.subr.mxu0 %v2199_v0  ;;  %1641 = vmatprep.subr.mxu1 %v2199_v0 }
  0x40   :  { %1609 = vmatpush3.msra.mxu0 %v2245_v2 }
  0x41   :  { %1610 = vmatprep.subr.mxu0 %v2199_v0 }
  0x42   :  { %1611 = vmatpush3.msra.mxu0 %v2249_v3 }
  0x43   :  { %1612 = vmatprep.subr.mxu0 %v2199_v0 }
  0x44   :  { %1613 = vmatpush3.msra.mxu0 %v2253_v4 }
  0x45   :  { %1614 = vmatprep.subr.mxu0 %v2199_v0 }
  0x46   :  { %1615 = vmatpush3.msra.mxu0 %v2259_v6 }
  0x47   :  { %1616 = vmatprep.subr.mxu0 %v2199_v0 }
  0x48   :  { %1617 = vmatpush3.msra.mxu0 %v2269_v9 }
  0x49   :  { %1618 = vmatprep.subr.mxu0 %v2199_v0 }
  0x4a   :  { %1619 = vmatpush3.msra.mxu0 %v2277_v11 }
  0x4b   :  { %1620 = vmatprep.subr.mxu0 %v2199_v0 }
  0x4c   :  { %1621 = vmatpush3.msra.mxu0 %v2285_v13 }
  0x4d   :  { %1622 = vmatprep.subr.mxu0 %v2199_v0 }
  0x4e   :  { %1623 = vmatpush3.msra.mxu0 %v2293_v15 }
  0x4f   :  { %1624 = vmatprep.subr.mxu0 %v2199_v0 }
  0x50   :  { %1625 = vmatpush3.msra.mxu0 %v2301_v17 }
  0x51   :  { %1626 = vmatprep.subr.mxu0 %v2199_v0 }
  0x52   :  { %1627 = vmatpush3.msra.mxu0 %v2307_v18 }
  0x53   :  { %1628 = vmatprep.subr.mxu0 %v2199_v0 }
  0x54   :  { %1629 = vmatpush3.msra.mxu0 %v2313_v19 }
  0x55   :  { %1630 = vmatprep.subr.mxu0 %v2199_v0 }
  0x56   :  { %1631 = vmatpush3.msra.mxu0 %v2317_v20 }
  0x57   :  { %1632 = vmatprep.subr.mxu0 %v2199_v0 }
  0x58   :  { %1633 = vmatpush3.msra.mxu0 %v2321_v21 }
  0x59   :  { %1634 = vmatprep.subr.mxu0 %v2199_v0 }
  0x5a   :  { %1635 = vmatpush3.msra.mxu0 %v2325_v22 }
  0x5b   :  { %1636 = vmatprep.subr.mxu0 %v2199_v0 }
  0x5c   :  { %1637 = vmatpush3.msra.mxu0 %v2329_v23 }
  0x5d   :  { %1676 = vmatprep.subr.mxu0 %v2199_v0 }
  0xfd   :  { %v138_v35 = vpop.f32.mrf.mxu0 }
  0xfe   :  { %v139_v36 = vadd.f32 %v2414_v34, %v138_v35 }
  0xff   :  { %v1570_v37 = vpop.f32.mrf.mxu0 }
 0x100   :  { %2102 = vtanh.f32 %v139_v36 }
 0x10d   :  { %v2103_v38 = vpop.eup %2102 }
 0x10e   :  { %1604 = vmatmul.mubr.f32.vlgmr.msra.gmra.mxu1 %v2103_v38 }
 0x10f   :  { %1642 = vmatpush3.msra.mxu1 %v2256_v5  ;;  %1673 = vmatprep.mubr.msk.f32.mxu1 %vm2200_vm0, %v2199_v0 }
 0x110   :  { %1643 = vmatprep.subr.mxu1 %v2199_v0 }
 0x111   :  { %1644 = vmatpush3.msra.mxu1 %v2262_v7 }
 0x112   :  { %1645 = vmatprep.subr.mxu1 %v2199_v0 }
 0x113   :  { %1646 = vmatpush3.msra.mxu1 %v2266_v8 }
 0x114   :  { %1647 = vmatprep.subr.mxu1 %v2199_v0 }
 0x115   :  { %1648 = vmatpush3.msra.mxu1 %v2274_v10 }
 0x116   :  { %1649 = vmatprep.subr.mxu1 %v2199_v0 }
 0x117   :  { %1650 = vmatpush3.msra.mxu1 %v2282_v12 }
 0x118   :  { %1651 = vmatprep.subr.mxu1 %v2199_v0 }
 0x119   :  { %1652 = vmatpush3.msra.mxu1 %v2290_v14 }
 0x11a   :  { %1653 = vmatprep.subr.mxu1 %v2199_v0 }
 0x11b   :  { %1654 = vmatpush3.msra.mxu1 %v2298_v16 }
 0x11c   :  { %1655 = vmatprep.subr.mxu1 %v2199_v0 }
 0x11d   :  { %1656 = vmatpush3.msra.mxu1 %v2375_v25 }
 0x11e   :  { %1657 = vmatprep.subr.mxu1 %v2199_v0 }
 0x11f   :  { %1658 = vmatpush3.msra.mxu1 %v2379_v26 }
 0x120   :  { %1659 = vmatprep.subr.mxu1 %v2199_v0 }
 0x121   :  { %1660 = vmatpush3.msra.mxu1 %v2383_v27 }
 0x122   :  { %1661 = vmatprep.subr.mxu1 %v2199_v0 }
 0x123   :  { %1662 = vmatpush3.msra.mxu1 %v2385_v28 }
 0x124   :  { %1663 = vmatprep.subr.mxu1 %v2199_v0 }
 0x125   :  { %1664 = vmatpush3.msra.mxu1 %v2389_v29 }
 0x126   :  { %1665 = vmatprep.subr.mxu1 %v2199_v0 }
 0x127   :  { %1666 = vmatpush3.msra.mxu1 %v2393_v30 }
 0x128   :  { %1667 = vmatprep.subr.mxu1 %v2199_v0 }
 0x129   :  { %1668 = vmatpush3.msra.mxu1 %v2397_v31 }
 0x12a   :  { %1669 = vmatprep.subr.mxu1 %v2199_v0 }
 0x12b   :  { %1670 = vmatpush3.msra.mxu1 %v2401_v32 }
 0x12c   :  { %1671 = vmatprep.subr.mxu1 %v2199_v0 }
 0x12d   :  { %1672 = vmatpush3.msra.mxu1 %v2405_v33 }
 0x12e   :  { %1711 = vmatprep.subr.mxu1 %v2199_v0 }
 0x1ce   :  { %v232_v40 = vpop.f32.mrf.mxu1 }
 0x1cf   :  { %v2457_v41 = vadd.f32 %v2454_v39, %v232_v40 }
 0x1d0   :  { %v1605_v42 = vpop.f32.mrf.mxu1 }
 0x1d1   :  { %v2460_v43 = vmul.f32 0.16666667, %v2457_v41 }
 0x1d3   :  { %v237_v44 = vadd.f32 %v2460_v43, %v2335_v24 }
 0x1d5   :  { %1639 = vmatmul.mubr.f32.vlgmr.msra.gmra.mxu0 %v237_v44 }
 0x1d6   :  { %1677 = vmatpush3.msra.mxu0 %v2243_v1  ;;  %1708 = vmatprep.mubr.msk.f32.mxu0 %vm2200_vm0, %v2199_v0 }
 0x1d7   :  { %1678 = vmatprep.subr.mxu0 %v2199_v0 }
 0x1d8   :  { %1679 = vmatpush3.msra.mxu0 %v2245_v2 }
 0x1d9   :  { %1680 = vmatprep.subr.mxu0 %v2199_v0 }
 0x1da   :  { %1681 = vmatpush3.msra.mxu0 %v2249_v3 }
 0x1db   :  { %1682 = vmatprep.subr.mxu0 %v2199_v0 }
 0x1dc   :  { %1683 = vmatpush3.msra.mxu0 %v2253_v4 }
 0x1dd   :  { %1684 = vmatprep.subr.mxu0 %v2199_v0 }
 0x1de   :  { %1685 = vmatpush3.msra.mxu0 %v2259_v6 }
 0x1df   :  { %1686 = vmatprep.subr.mxu0 %v2199_v0 }
 0x1e0   :  { %1687 = vmatpush3.msra.mxu0 %v2269_v9 }
 0x1e1   :  { %1688 = vmatprep.subr.mxu0 %v2199_v0 }
 0x1e2   :  { %1689 = vmatpush3.msra.mxu0 %v2277_v11 }
 0x1e3   :  { %1690 = vmatprep.subr.mxu0 %v2199_v0 }
 0x1e4   :  { %1691 = vmatpush3.msra.mxu0 %v2285_v13 }
 0x1e5   :  { %1692 = vmatprep.subr.mxu0 %v2199_v0 }
 0x1e6   :  { %1693 = vmatpush3.msra.mxu0 %v2293_v15 }
 0x1e7   :  { %1694 = vmatprep.subr.mxu0 %v2199_v0 }
 0x1e8   :  { %1695 = vmatpush3.msra.mxu0 %v2301_v17 }
 0x1e9   :  { %1696 = vmatprep.subr.mxu0 %v2199_v0 }
 0x1ea   :  { %1697 = vmatpush3.msra.mxu0 %v2307_v18 }
 0x1eb   :  { %1698 = vmatprep.subr.mxu0 %v2199_v0 }
 0x1ec   :  { %1699 = vmatpush3.msra.mxu0 %v2313_v19 }
 0x1ed   :  { %1700 = vmatprep.subr.mxu0 %v2199_v0 }
 0x1ee   :  { %1701 = vmatpush3.msra.mxu0 %v2317_v20 }
 0x1ef   :  { %1702 = vmatprep.subr.mxu0 %v2199_v0 }
 0x1f0   :  { %1703 = vmatpush3.msra.mxu0 %v2321_v21 }
 0x1f1   :  { %1704 = vmatprep.subr.mxu0 %v2199_v0 }
 0x1f2   :  { %1705 = vmatpush3.msra.mxu0 %v2325_v22 }
 0x1f3   :  { %1706 = vmatprep.subr.mxu0 %v2199_v0 }
 0x1f4   :  { %1707 = vmatpush3.msra.mxu0 %v2329_v23 }
 0x1f5   :  { %1746 = vmatprep.subr.mxu0 %v2199_v0 }
 0x295   :  { %v304_v45 = vpop.f32.mrf.mxu0 }
 0x296   :  { %v305_v46 = vadd.f32 %v2414_v34, %v304_v45 }
 0x297   :  { %v1640_v47 = vpop.f32.mrf.mxu0 }
 0x298   :  { %2104 = vtanh.f32 %v305_v46 }
 0x2a5   :  { %v2105_v48 = vpop.eup %2104 }
 0x2a6   :  { %1674 = vmatmul.mubr.f32.vlgmr.msra.gmra.mxu1 %v2105_v48 }
 0x2a7   :  { %1712 = vmatpush3.msra.mxu1 %v2256_v5  ;;  %1743 = vmatprep.mubr.msk.f32.mxu1 %vm2200_vm0, %v2199_v0 }
 0x2a8   :  { %1713 = vmatprep.subr.mxu1 %v2199_v0 }
 0x2a9   :  { %1714 = vmatpush3.msra.mxu1 %v2262_v7 }
 0x2aa   :  { %1715 = vmatprep.subr.mxu1 %v2199_v0 }
 0x2ab   :  { %1716 = vmatpush3.msra.mxu1 %v2266_v8 }
 0x2ac   :  { %1717 = vmatprep.subr.mxu1 %v2199_v0 }
 0x2ad   :  { %1718 = vmatpush3.msra.mxu1 %v2274_v10 }
 0x2ae   :  { %1719 = vmatprep.subr.mxu1 %v2199_v0 }
 0x2af   :  { %1720 = vmatpush3.msra.mxu1 %v2282_v12 }
 0x2b0   :  { %1721 = vmatprep.subr.mxu1 %v2199_v0 }
 0x2b1   :  { %1722 = vmatpush3.msra.mxu1 %v2290_v14 }
 0x2b2   :  { %1723 = vmatprep.subr.mxu1 %v2199_v0 }
 0x2b3   :  { %1724 = vmatpush3.msra.mxu1 %v2298_v16 }
 0x2b4   :  { %1725 = vmatprep.subr.mxu1 %v2199_v0 }
 0x2b5   :  { %1726 = vmatpush3.msra.mxu1 %v2375_v25 }
 0x2b6   :  { %1727 = vmatprep.subr.mxu1 %v2199_v0 }
 0x2b7   :  { %1728 = vmatpush3.msra.mxu1 %v2379_v26 }
 0x2b8   :  { %1729 = vmatprep.subr.mxu1 %v2199_v0 }
 0x2b9   :  { %1730 = vmatpush3.msra.mxu1 %v2383_v27 }
 0x2ba   :  { %1731 = vmatprep.subr.mxu1 %v2199_v0 }
 0x2bb   :  { %1732 = vmatpush3.msra.mxu1 %v2385_v28 }
 0x2bc   :  { %1733 = vmatprep.subr.mxu1 %v2199_v0 }
 0x2bd   :  { %1734 = vmatpush3.msra.mxu1 %v2389_v29 }
 0x2be   :  { %1735 = vmatprep.subr.mxu1 %v2199_v0 }
 0x2bf   :  { %1736 = vmatpush3.msra.mxu1 %v2393_v30 }
 0x2c0   :  { %1737 = vmatprep.subr.mxu1 %v2199_v0 }
 0x2c1   :  { %1738 = vmatpush3.msra.mxu1 %v2397_v31 }
 0x2c2   :  { %1739 = vmatprep.subr.mxu1 %v2199_v0 }
 0x2c3   :  { %1740 = vmatpush3.msra.mxu1 %v2401_v32 }
 0x2c4   :  { %1741 = vmatprep.subr.mxu1 %v2199_v0 }
 0x2c5   :  { %1742 = vmatpush3.msra.mxu1 %v2405_v33 }
 0x2c6   :  { %1781 = vmatprep.subr.mxu1 %v2199_v0 }
 0x366   :  { %v375_v49 = vpop.f32.mrf.mxu1 }
 0x367   :  { %v2534_v50 = vadd.f32 %v2454_v39, %v375_v49 }
 0x368   :  { %v1675_v51 = vpop.f32.mrf.mxu1 }
 0x369   :  { %v379_v52 = vmul.f32 0.5, %v2534_v50  ;;  %v383_v59 = vmul.f32 3.0, %v2534_v50  ;;  %v382_v61 = vsub.f32 %v2457_v41, %v2534_v50 }
 0x36b   :  { %v380_v53 = vadd.f32 %v379_v52, %v2335_v24  ;;  %v384_v37 = vadd.f32 %v383_v59, %v2457_v41  ;;  %v2139_v59 = vld [vmem:[#allocation2] sm:$0xff] }
 0x36d   :  { %v381_v54 = vsub.f32 %v380_v53, %v2460_v43 }
 0x36f   :  { %1709 = vmatmul.mubr.f32.vlgmr.msra.gmra.mxu0 %v381_v54 }
 0x370   :  { %1747 = vmatpush3.msra.mxu0 %v2243_v1  ;;  %1778 = vmatprep.mubr.msk.f32.mxu0 %vm2200_vm0, %v2199_v0 }
 0x371   :  { %1748 = vmatprep.subr.mxu0 %v2199_v0 }
 0x372   :  { %1749 = vmatpush3.msra.mxu0 %v2245_v2 }
 0x373   :  { %1750 = vmatprep.subr.mxu0 %v2199_v0 }
 0x374   :  { %1751 = vmatpush3.msra.mxu0 %v2249_v3 }
 0x375   :  { %1752 = vmatprep.subr.mxu0 %v2199_v0 }
 0x376   :  { %1753 = vmatpush3.msra.mxu0 %v2253_v4 }
 0x377   :  { %1754 = vmatprep.subr.mxu0 %v2199_v0 }
 0x378   :  { %1755 = vmatpush3.msra.mxu0 %v2259_v6 }
 0x379   :  { %1756 = vmatprep.subr.mxu0 %v2199_v0 }
 0x37a   :  { %1757 = vmatpush3.msra.mxu0 %v2269_v9 }
 0x37b   :  { %1758 = vmatprep.subr.mxu0 %v2199_v0 }
 0x37c   :  { %1759 = vmatpush3.msra.mxu0 %v2277_v11 }
 0x37d   :  { %1760 = vmatprep.subr.mxu0 %v2199_v0 }
 0x37e   :  { %1761 = vmatpush3.msra.mxu0 %v2285_v13 }
 0x37f   :  { %1762 = vmatprep.subr.mxu0 %v2199_v0 }
 0x380   :  { %1763 = vmatpush3.msra.mxu0 %v2293_v15 }
 0x381   :  { %1764 = vmatprep.subr.mxu0 %v2199_v0 }
 0x382   :  { %1765 = vmatpush3.msra.mxu0 %v2301_v17 }
 0x383   :  { %1766 = vmatprep.subr.mxu0 %v2199_v0 }
 0x384   :  { %1767 = vmatpush3.msra.mxu0 %v2307_v18 }
 0x385   :  { %1768 = vmatprep.subr.mxu0 %v2199_v0 }
 0x386   :  { %1769 = vmatpush3.msra.mxu0 %v2313_v19 }
 0x387   :  { %1770 = vmatprep.subr.mxu0 %v2199_v0 }
 0x388   :  { %1771 = vmatpush3.msra.mxu0 %v2317_v20 }
 0x389   :  { %1772 = vmatprep.subr.mxu0 %v2199_v0 }
 0x38a   :  { %1773 = vmatpush3.msra.mxu0 %v2321_v21 }
 0x38b   :  { %1774 = vmatprep.subr.mxu0 %v2199_v0 }
 0x38c   :  { %1775 = vmatpush3.msra.mxu0 %v2325_v22 }
 0x38d   :  { %1776 = vmatprep.subr.mxu0 %v2199_v0 }
 0x38e   :  { %1777 = vmatpush3.msra.mxu0 %v2329_v23 }
 0x38f   :  { %1816 = vmatprep.subr.mxu0 %v2199_v0 }
 0x42f   :  { %v451_v55 = vpop.f32.mrf.mxu0 }
 0x430   :  { %v452_v56 = vadd.f32 %v2414_v34, %v451_v55  ;;  %v2135_v55 = vld [vmem:[#allocation2 + $0x20] sm:$0xff] }
 0x431   :  { %v1710_v57 = vpop.f32.mrf.mxu0 }
 0x432   :  { %2106 = vtanh.f32 %v452_v56  ;;  %v2136_v56 = vld [vmem:[#allocation2 + $0x18] sm:$0xff]  ;;  %v2137_v57 = vld [vmem:[#allocation2 + $0x10] sm:$0xff] }
 0x43f   :  { %v2107_v58 = vpop.eup %2106 }
 0x440   :  { %1744 = vmatmul.mubr.f32.vlgmr.msra.gmra.mxu1 %v2107_v58  ;;  %v2138_v58 = vld [vmem:[#allocation2 + $0x8] sm:$0xff] }
 0x441   :  { %1782 = vmatpush3.msra.mxu1 %v2256_v5  ;;  %1813 = vmatprep.mubr.msk.f32.mxu1 %vm2200_vm0, %v2199_v0 }
 0x442   :  { %1783 = vmatprep.subr.mxu1 %v2199_v0 }
 0x443   :  { %1784 = vmatpush3.msra.mxu1 %v2262_v7 }
 0x444   :  { %1785 = vmatprep.subr.mxu1 %v2199_v0 }
 0x445   :  { %1786 = vmatpush3.msra.mxu1 %v2266_v8 }
 0x446   :  { %1787 = vmatprep.subr.mxu1 %v2199_v0 }
 0x447   :  { %1788 = vmatpush3.msra.mxu1 %v2274_v10 }
 0x448   :  { %1789 = vmatprep.subr.mxu1 %v2199_v0 }
 0x449   :  { %1790 = vmatpush3.msra.mxu1 %v2282_v12 }
 0x44a   :  { %1791 = vmatprep.subr.mxu1 %v2199_v0 }
 0x44b   :  { %1792 = vmatpush3.msra.mxu1 %v2290_v14 }
 0x44c   :  { %1793 = vmatprep.subr.mxu1 %v2199_v0 }
 0x44d   :  { %1794 = vmatpush3.msra.mxu1 %v2298_v16 }
 0x44e   :  { %1795 = vmatprep.subr.mxu1 %v2199_v0 }
 0x44f   :  { %1796 = vmatpush3.msra.mxu1 %v2375_v25 }
 0x450   :  { %1797 = vmatprep.subr.mxu1 %v2199_v0 }
 0x451   :  { %1798 = vmatpush3.msra.mxu1 %v2379_v26 }
 0x452   :  { %1799 = vmatprep.subr.mxu1 %v2199_v0 }
 0x453   :  { %1800 = vmatpush3.msra.mxu1 %v2383_v27 }
 0x454   :  { %1801 = vmatprep.subr.mxu1 %v2199_v0 }
 0x455   :  { %1802 = vmatpush3.msra.mxu1 %v2385_v28 }
 0x456   :  { %1803 = vmatprep.subr.mxu1 %v2199_v0 }
 0x457   :  { %1804 = vmatpush3.msra.mxu1 %v2389_v29 }
 0x458   :  { %1805 = vmatprep.subr.mxu1 %v2199_v0 }
 0x459   :  { %1806 = vmatpush3.msra.mxu1 %v2393_v30 }
 0x45a   :  { %1807 = vmatprep.subr.mxu1 %v2199_v0 }
 0x45b   :  { %1808 = vmatpush3.msra.mxu1 %v2397_v31 }
 0x45c   :  { %1809 = vmatprep.subr.mxu1 %v2199_v0 }
 0x45d   :  { %1810 = vmatpush3.msra.mxu1 %v2401_v32 }
 0x45e   :  { %1811 = vmatprep.subr.mxu1 %v2199_v0 }
 0x45f   :  { %1812 = vmatpush3.msra.mxu1 %v2405_v33 }
 0x460   :  { %1851 = vmatprep.subr.mxu1 %v2199_v0 }
 0x500   :  { %v522_v60 = vpop.f32.mrf.mxu1 }
 0x501   :  { %v523_v62 = vadd.f32 %v2454_v39, %v522_v60 }
 0x502   :  { %v1745_v63 = vpop.f32.mrf.mxu1 }
 0x503   :  { %v526_v35 = vadd.f32 %v523_v62, %v382_v61  ;;  %v529_v36 = vmul.f32 3.0, %v523_v62 }
 0x505   :  { %v527_v38 = vmul.f32 0.5, %v526_v35  ;;  %v2613_v40 = vadd.f32 %v529_v36, %v384_v37  ;;  %v2141_v35 = vld [vmem:[#allocation4 + $0x40] sm:$0xff]  ;;  %v2142_v36 = vld [vmem:[#allocation4 + $0x38] sm:$0xff]  ;;  %v2143_v37 = vld [vmem:[#allocation4 + $0x30] sm:$0xff] }
 0x507   :  { %v528_v42 = vadd.f32 %v527_v38, %v2335_v24  ;;  %v2144_v38 = vld [vmem:[#allocation4 + $0x28] sm:$0xff] }
 0x509   :  { %1779 = vmatmul.mubr.f32.vlgmr.msra.gmra.mxu0 %v528_v42  ;;  %v2146_v42 = vld [vmem:[#allocation4 + $0x18] sm:$0xff] }
 0x50a   :  { %1817 = vmatpush3.msra.mxu0 %v2243_v1  ;;  %1848 = vmatprep.mubr.msk.f32.mxu0 %vm2200_vm0, %v2199_v0 }
 0x50b   :  { %1818 = vmatprep.subr.mxu0 %v2199_v0 }
 0x50c   :  { %1819 = vmatpush3.msra.mxu0 %v2245_v2 }
 0x50d   :  { %1820 = vmatprep.subr.mxu0 %v2199_v0 }
 0x50e   :  { %1821 = vmatpush3.msra.mxu0 %v2249_v3 }
 0x50f   :  { %1822 = vmatprep.subr.mxu0 %v2199_v0 }
 0x510   :  { %1823 = vmatpush3.msra.mxu0 %v2253_v4 }
 0x511   :  { %1824 = vmatprep.subr.mxu0 %v2199_v0 }
 0x512   :  { %1825 = vmatpush3.msra.mxu0 %v2259_v6 }
 0x513   :  { %1826 = vmatprep.subr.mxu0 %v2199_v0 }
 0x514   :  { %1827 = vmatpush3.msra.mxu0 %v2269_v9 }
 0x515   :  { %1828 = vmatprep.subr.mxu0 %v2199_v0 }
 0x516   :  { %1829 = vmatpush3.msra.mxu0 %v2277_v11 }
 0x517   :  { %1830 = vmatprep.subr.mxu0 %v2199_v0 }
 0x518   :  { %1831 = vmatpush3.msra.mxu0 %v2285_v13 }
 0x519   :  { %1832 = vmatprep.subr.mxu0 %v2199_v0 }
 0x51a   :  { %1833 = vmatpush3.msra.mxu0 %v2293_v15 }
 0x51b   :  { %1834 = vmatprep.subr.mxu0 %v2199_v0 }
 0x51c   :  { %1835 = vmatpush3.msra.mxu0 %v2301_v17 }
 0x51d   :  { %1836 = vmatprep.subr.mxu0 %v2199_v0 }
 0x51e   :  { %1837 = vmatpush3.msra.mxu0 %v2307_v18 }
 0x51f   :  { %1838 = vmatprep.subr.mxu0 %v2199_v0 }
 0x520   :  { %1839 = vmatpush3.msra.mxu0 %v2313_v19 }
 0x521   :  { %1840 = vmatprep.subr.mxu0 %v2199_v0 }
 0x522   :  { %1841 = vmatpush3.msra.mxu0 %v2317_v20 }
 0x523   :  { %1842 = vmatprep.subr.mxu0 %v2199_v0 }
 0x524   :  { %1843 = vmatpush3.msra.mxu0 %v2321_v21 }
 0x525   :  { %1844 = vmatprep.subr.mxu0 %v2199_v0 }
 0x526   :  { %1845 = vmatpush3.msra.mxu0 %v2325_v22 }
 0x527   :  { %1846 = vmatprep.subr.mxu0 %v2199_v0 }
 0x528   :  { %1847 = vmatpush3.msra.mxu0 %v2329_v23 }
 0x529   :  { %1886 = vmatprep.subr.mxu0 %v2199_v0 }
 0x5c9   :  { %v597_v41 = vpop.f32.mrf.mxu0 }
 0x5ca   :  { %v598_v43 = vadd.f32 %v2414_v34, %v597_v41  ;;  %v2147_v41 = vld [vmem:[#allocation4 + $0x10] sm:$0xff] }
 0x5cb   :  { %v1780_v44 = vpop.f32.mrf.mxu0 }
 0x5cc   :  { %2108 = vtanh.f32 %v598_v43  ;;  %v2148_v43 = vld [vmem:[#allocation4 + $0x8] sm:$0xff]  ;;  %v2149_v44 = vld [vmem:[#allocation4] sm:$0xff] }
 0x5d9   :  { %v2109_v45 = vpop.eup %2108 }
 0x5da   :  { %1814 = vmatmul.mubr.f32.vlgmr.msra.gmra.mxu1 %v2109_v45 }
 0x5db   :  { %1852 = vmatpush3.msra.mxu1 %v2256_v5  ;;  %1883 = vmatprep.mubr.msk.f32.mxu1 %vm2200_vm0, %v2199_v0 }
 0x5dc   :  { %1853 = vmatprep.subr.mxu1 %v2199_v0 }
 0x5dd   :  { %1854 = vmatpush3.msra.mxu1 %v2262_v7 }
 0x5de   :  { %1855 = vmatprep.subr.mxu1 %v2199_v0 }
 0x5df   :  { %1856 = vmatpush3.msra.mxu1 %v2266_v8 }
 0x5e0   :  { %1857 = vmatprep.subr.mxu1 %v2199_v0 }
 0x5e1   :  { %1858 = vmatpush3.msra.mxu1 %v2274_v10 }
 0x5e2   :  { %1859 = vmatprep.subr.mxu1 %v2199_v0 }
 0x5e3   :  { %1860 = vmatpush3.msra.mxu1 %v2282_v12 }
 0x5e4   :  { %1861 = vmatprep.subr.mxu1 %v2199_v0 }
 0x5e5   :  { %1862 = vmatpush3.msra.mxu1 %v2290_v14 }
 0x5e6   :  { %1863 = vmatprep.subr.mxu1 %v2199_v0 }
 0x5e7   :  { %1864 = vmatpush3.msra.mxu1 %v2298_v16 }
 0x5e8   :  { %1865 = vmatprep.subr.mxu1 %v2199_v0 }
 0x5e9   :  { %1866 = vmatpush3.msra.mxu1 %v2375_v25 }
 0x5ea   :  { %1867 = vmatprep.subr.mxu1 %v2199_v0 }
 0x5eb   :  { %1868 = vmatpush3.msra.mxu1 %v2379_v26 }
 0x5ec   :  { %1869 = vmatprep.subr.mxu1 %v2199_v0 }
 0x5ed   :  { %1870 = vmatpush3.msra.mxu1 %v2383_v27 }
 0x5ee   :  { %1871 = vmatprep.subr.mxu1 %v2199_v0 }
 0x5ef   :  { %1872 = vmatpush3.msra.mxu1 %v2385_v28 }
 0x5f0   :  { %1873 = vmatprep.subr.mxu1 %v2199_v0 }
 0x5f1   :  { %1874 = vmatpush3.msra.mxu1 %v2389_v29 }
 0x5f2   :  { %1875 = vmatprep.subr.mxu1 %v2199_v0 }
 0x5f3   :  { %1876 = vmatpush3.msra.mxu1 %v2393_v30 }
 0x5f4   :  { %1877 = vmatprep.subr.mxu1 %v2199_v0 }
 0x5f5   :  { %1878 = vmatpush3.msra.mxu1 %v2397_v31 }
 0x5f6   :  { %1879 = vmatprep.subr.mxu1 %v2199_v0 }
 0x5f7   :  { %1880 = vmatpush3.msra.mxu1 %v2401_v32 }
 0x5f8   :  { %1881 = vmatprep.subr.mxu1 %v2199_v0 }
 0x5f9   :  { %1882 = vmatpush3.msra.mxu1 %v2405_v33 }
 0x5fa   :  { %1921 = vmatprep.subr.mxu1 %v2199_v0 }
 0x69a   :  { %v668_v46 = vpop.f32.mrf.mxu1 }
 0x69b   :  { %v669_v47 = vadd.f32 %v2454_v39, %v668_v46 }
 0x69c   :  { %v1815_v48 = vpop.f32.mrf.mxu1 }
 0x69d   :  { %v672_v49 = vadd.f32 %v669_v47, %v2613_v40  ;;  %v2145_v40 = vld [vmem:[#allocation4 + $0x20] sm:$0xff] }
 0x69f   :  { %v673_v50 = vmul.f32 0.0625, %v672_v49 }
 0x6a1   :  { %v2688_v51 = vadd.f32 %v673_v50, %v2335_v24 }
 0x6a3   :  { %1849 = vmatmul.mubr.f32.vlgmr.msra.gmra.mxu0 %v2688_v51 }
 0x6a4   :  { %1887 = vmatpush3.msra.mxu0 %v2243_v1  ;;  %1918 = vmatprep.mubr.msk.f32.mxu0 %vm2200_vm0, %v2199_v0 }
 0x6a5   :  { %1888 = vmatprep.subr.mxu0 %v2199_v0 }
 0x6a6   :  { %1889 = vmatpush3.msra.mxu0 %v2245_v2 }
 0x6a7   :  { %1890 = vmatprep.subr.mxu0 %v2199_v0 }
 0x6a8   :  { %1891 = vmatpush3.msra.mxu0 %v2249_v3 }
 0x6a9   :  { %1892 = vmatprep.subr.mxu0 %v2199_v0 }
 0x6aa   :  { %1893 = vmatpush3.msra.mxu0 %v2253_v4 }
 0x6ab   :  { %1894 = vmatprep.subr.mxu0 %v2199_v0 }
 0x6ac   :  { %1895 = vmatpush3.msra.mxu0 %v2259_v6 }
 0x6ad   :  { %1896 = vmatprep.subr.mxu0 %v2199_v0 }
 0x6ae   :  { %1897 = vmatpush3.msra.mxu0 %v2269_v9 }
 0x6af   :  { %1898 = vmatprep.subr.mxu0 %v2199_v0 }
 0x6b0   :  { %1899 = vmatpush3.msra.mxu0 %v2277_v11 }
 0x6b1   :  { %1900 = vmatprep.subr.mxu0 %v2199_v0 }
 0x6b2   :  { %1901 = vmatpush3.msra.mxu0 %v2285_v13 }
 0x6b3   :  { %1902 = vmatprep.subr.mxu0 %v2199_v0 }
 0x6b4   :  { %1903 = vmatpush3.msra.mxu0 %v2293_v15 }
 0x6b5   :  { %1904 = vmatprep.subr.mxu0 %v2199_v0 }
 0x6b6   :  { %1905 = vmatpush3.msra.mxu0 %v2301_v17 }
 0x6b7   :  { %1906 = vmatprep.subr.mxu0 %v2199_v0 }
 0x6b8   :  { %1907 = vmatpush3.msra.mxu0 %v2307_v18 }
 0x6b9   :  { %1908 = vmatprep.subr.mxu0 %v2199_v0 }
 0x6ba   :  { %1909 = vmatpush3.msra.mxu0 %v2313_v19 }
 0x6bb   :  { %1910 = vmatprep.subr.mxu0 %v2199_v0 }
 0x6bc   :  { %1911 = vmatpush3.msra.mxu0 %v2317_v20 }
 0x6bd   :  { %1912 = vmatprep.subr.mxu0 %v2199_v0 }
 0x6be   :  { %1913 = vmatpush3.msra.mxu0 %v2321_v21 }
 0x6bf   :  { %1914 = vmatprep.subr.mxu0 %v2199_v0 }
 0x6c0   :  { %1915 = vmatpush3.msra.mxu0 %v2325_v22 }
 0x6c1   :  { %1916 = vmatprep.subr.mxu0 %v2199_v0 }
 0x6c2   :  { %1917 = vmatpush3.msra.mxu0 %v2329_v23 }
 0x6c3   :  { %1956 = vmatprep.subr.mxu0 %v2199_v0 }
 0x763   :  { %v741_v24 = vpop.f32.mrf.mxu0 }
 0x764   :  { %v742_v52 = vadd.f32 %v2414_v34, %v741_v24 }
 0x765   :  { %v1850_v53 = vpop.f32.mrf.mxu0 }
 0x766   :  { %2110 = vtanh.f32 %v742_v52 }
 0x773   :  { %v2111_v54 = vpop.eup %2110 }
 0x774   :  { %1884 = vmatmul.mubr.f32.vlgmr.msra.gmra.mxu1 %v2111_v54 }
 0x775   :  { %1922 = vmatpush3.msra.mxu1 %v2256_v5  ;;  %1953 = vmatprep.mubr.msk.f32.mxu1 %vm2200_vm0, %v2199_v0 }
 0x776   :  { %1923 = vmatprep.subr.mxu1 %v2199_v0 }
 0x777   :  { %1924 = vmatpush3.msra.mxu1 %v2262_v7 }
 0x778   :  { %1925 = vmatprep.subr.mxu1 %v2199_v0 }
 0x779   :  { %1926 = vmatpush3.msra.mxu1 %v2266_v8 }
 0x77a   :  { %1927 = vmatprep.subr.mxu1 %v2199_v0 }
 0x77b   :  { %1928 = vmatpush3.msra.mxu1 %v2274_v10 }
 0x77c   :  { %1929 = vmatprep.subr.mxu1 %v2199_v0 }
 0x77d   :  { %1930 = vmatpush3.msra.mxu1 %v2282_v12 }
 0x77e   :  { %1931 = vmatprep.subr.mxu1 %v2199_v0 }
 0x77f   :  { %1932 = vmatpush3.msra.mxu1 %v2290_v14  ;;  %v2821_v14 = vld [vmem:[#allocation4 + $0x58] sm:$0xff] }
 0x780   :  { %1933 = vmatprep.subr.mxu1 %v2199_v0 }
 0x781   :  { %1934 = vmatpush3.msra.mxu1 %v2298_v16 }
 0x782   :  { %1935 = vmatprep.subr.mxu1 %v2199_v0 }
 0x783   :  { %1936 = vmatpush3.msra.mxu1 %v2375_v25 }
 0x784   :  { %1937 = vmatprep.subr.mxu1 %v2199_v0 }
 0x785   :  { %1938 = vmatpush3.msra.mxu1 %v2379_v26 }
 0x786   :  { %1939 = vmatprep.subr.mxu1 %v2199_v0 }
 0x787   :  { %1940 = vmatpush3.msra.mxu1 %v2383_v27 }
 0x788   :  { %1941 = vmatprep.subr.mxu1 %v2199_v0 }
 0x789   :  { %1942 = vmatpush3.msra.mxu1 %v2385_v28 }
 0x78a   :  { %1943 = vmatprep.subr.mxu1 %v2199_v0 }
 0x78b   :  { %1944 = vmatpush3.msra.mxu1 %v2389_v29 }
 0x78c   :  { %1945 = vmatprep.subr.mxu1 %v2199_v0 }
 0x78d   :  { %1946 = vmatpush3.msra.mxu1 %v2393_v30 }
 0x78e   :  { %1947 = vmatprep.subr.mxu1 %v2199_v0 }
 0x78f   :  { %1948 = vmatpush3.msra.mxu1 %v2397_v31 }
 0x790   :  { %1949 = vmatprep.subr.mxu1 %v2199_v0 }
 0x791   :  { %1950 = vmatpush3.msra.mxu1 %v2401_v32 }
 0x792   :  { %1951 = vmatprep.subr.mxu1 %v2199_v0 }
 0x793   :  { %1952 = vmatpush3.msra.mxu1 %v2405_v33 }
 0x794   :  { %1991 = vmatprep.subr.mxu1 %v2199_v0 }
 0x834   :  { %v812_v5 = vpop.f32.mrf.mxu1 }
 0x835   :  { %v2761_v7 = vadd.f32 %v2454_v39, %v812_v5 }
 0x836   :  { %v1885_v8 = vpop.f32.mrf.mxu1 }
 0x837   :  { %v2764_v10 = vmul.f32 0.16666667, %v2761_v7  ;;  %v2150_v8 = vld [vmem:[%s2912_s2] ss:$0 sm:$0xff] }
 0x839   :  { %v817_v12 = vadd.f32 %v2764_v10, %v2688_v51 }
 0x83b   :  { %1919 = vmatmul.mubr.f32.vlgmr.msra.gmra.mxu0 %v817_v12 }
 0x83c   :  { %1957 = vmatpush3.msra.mxu0 %v2243_v1  ;;  %1988 = vmatprep.mubr.msk.f32.mxu0 %vm2200_vm0, %v2199_v0 }
 0x83d   :  { %1958 = vmatprep.subr.mxu0 %v2199_v0 }
 0x83e   :  { %1959 = vmatpush3.msra.mxu0 %v2245_v2 }
 0x83f   :  { %1960 = vmatprep.subr.mxu0 %v2199_v0 }
 0x840   :  { %1961 = vmatpush3.msra.mxu0 %v2249_v3 }
 0x841   :  { %1962 = vmatprep.subr.mxu0 %v2199_v0 }
 0x842   :  { %1963 = vmatpush3.msra.mxu0 %v2253_v4 }
 0x843   :  { %1964 = vmatprep.subr.mxu0 %v2199_v0 }
 0x844   :  { %1965 = vmatpush3.msra.mxu0 %v2259_v6  ;;  %v2803_v6 = vld [vmem:[#allocation4 + $0x78] sm:$0xff] }
 0x845   :  { %1966 = vmatprep.subr.mxu0 %v2199_v0 }
 0x846   :  { %1967 = vmatpush3.msra.mxu0 %v2269_v9  ;;  %v2809_v9 = vld [vmem:[#allocation4 + $0x70] sm:$0xff] }
 0x847   :  { %1968 = vmatprep.subr.mxu0 %v2199_v0 }
 0x848   :  { %1969 = vmatpush3.msra.mxu0 %v2277_v11  ;;  %v2813_v11 = vld [vmem:[#allocation4 + $0x68] sm:$0xff] }
 0x849   :  { %1970 = vmatprep.subr.mxu0 %v2199_v0 }
 0x84a   :  { %1971 = vmatpush3.msra.mxu0 %v2285_v13  ;;  %v2817_v13 = vld [vmem:[#allocation4 + $0x60] sm:$0xff] }
 0x84b   :  { %1972 = vmatprep.subr.mxu0 %v2199_v0 }
 0x84c   :  { %1973 = vmatpush3.msra.mxu0 %v2293_v15  ;;  %v2825_v15 = vld [vmem:[#allocation4 + $0x50] sm:$0xff] }
 0x84d   :  { %1974 = vmatprep.subr.mxu0 %v2199_v0 }
 0x84e   :  { %1975 = vmatpush3.msra.mxu0 %v2301_v17 }
 0x84f   :  { %1976 = vmatprep.subr.mxu0 %v2199_v0 }
 0x850   :  { %1977 = vmatpush3.msra.mxu0 %v2307_v18 }
 0x851   :  { %1978 = vmatprep.subr.mxu0 %v2199_v0 }
 0x852   :  { %1979 = vmatpush3.msra.mxu0 %v2313_v19 }
 0x853   :  { %1980 = vmatprep.subr.mxu0 %v2199_v0 }
 0x854   :  { %1981 = vmatpush3.msra.mxu0 %v2317_v20 }
 0x855   :  { %1982 = vmatprep.subr.mxu0 %v2199_v0 }
 0x856   :  { %1983 = vmatpush3.msra.mxu0 %v2321_v21 }
 0x857   :  { %1984 = vmatprep.subr.mxu0 %v2199_v0 }
 0x858   :  { %1985 = vmatpush3.msra.mxu0 %v2325_v22  ;;  %v2124_v22 = vld [vmem:[#allocation2 + $0x78] sm:$0xff] }
 0x859   :  { %1986 = vmatprep.subr.mxu0 %v2199_v0 }
 0x85a   :  { %1987 = vmatpush3.msra.mxu0 %v2329_v23  ;;  %v2125_v23 = vld [vmem:[#allocation2 + $0x70] sm:$0xff] }
 0x85b   :  { %2026 = vmatprep.subr.mxu0 %v2199_v0 }
 0x8fb   :  { %v884_v1 = vpop.f32.mrf.mxu0 }
 0x8fc   :  { %v885_v2 = vadd.f32 %v2414_v34, %v884_v1 }
 0x8fd   :  { %v1920_v3 = vpop.f32.mrf.mxu0 }
 0x8fe   :  { %2112 = vtanh.f32 %v885_v2 }
 0x90b   :  { %v2113_v4 = vpop.eup %2112 }
 0x90c   :  { %1954 = vmatmul.mubr.f32.vlgmr.msra.gmra.mxu1 %v2113_v4 }
 0x90d   :  { %1992 = vmatpush3.msra.mxu1 %v2803_v6  ;;  %2023 = vmatprep.mubr.msk.f32.mxu1 %vm2200_vm0, %v2199_v0 }
 0x90e   :  { %1993 = vmatprep.subr.mxu1 %v2199_v0 }
 0x90f   :  { %1994 = vmatpush3.msra.mxu1 %v2809_v9 }
 0x910   :  { %1995 = vmatprep.subr.mxu1 %v2199_v0 }
 0x911   :  { %1996 = vmatpush3.msra.mxu1 %v2813_v11 }
 0x912   :  { %1997 = vmatprep.subr.mxu1 %v2199_v0 }
 0x913   :  { %1998 = vmatpush3.msra.mxu1 %v2817_v13 }
 0x914   :  { %1999 = vmatprep.subr.mxu1 %v2199_v0 }
 0x915   :  { %2000 = vmatpush3.msra.mxu1 %v2821_v14 }
 0x916   :  { %2001 = vmatprep.subr.mxu1 %v2199_v0 }
 0x917   :  { %2002 = vmatpush3.msra.mxu1 %v2825_v15 }
 0x918   :  { %2003 = vmatprep.subr.mxu1 %v2199_v0 }
 0x919   :  { %2004 = vmatpush3.msra.mxu1 %v2298_v16 }
 0x91a   :  { %2005 = vmatprep.subr.mxu1 %v2199_v0 }
 0x91b   :  { %2006 = vmatpush3.msra.mxu1 %v2375_v25  ;;  %v2126_v25 = vld [vmem:[#allocation2 + $0x68] sm:$0xff] }
 0x91c   :  { %2007 = vmatprep.subr.mxu1 %v2199_v0 }
 0x91d   :  { %2008 = vmatpush3.msra.mxu1 %v2379_v26  ;;  %v2127_v26 = vld [vmem:[#allocation2 + $0x60] sm:$0xff] }
 0x91e   :  { %2009 = vmatprep.subr.mxu1 %v2199_v0 }
 0x91f   :  { %2010 = vmatpush3.msra.mxu1 %v2383_v27  ;;  %v2128_v27 = vld [vmem:[#allocation2 + $0x58] sm:$0xff] }
 0x920   :  { %2011 = vmatprep.subr.mxu1 %v2199_v0 }
 0x921   :  { %2012 = vmatpush3.msra.mxu1 %v2385_v28  ;;  %v2129_v28 = vld [vmem:[#allocation2 + $0x50] sm:$0xff] }
 0x922   :  { %2013 = vmatprep.subr.mxu1 %v2199_v0 }
 0x923   :  { %2014 = vmatpush3.msra.mxu1 %v2389_v29  ;;  %v2130_v29 = vld [vmem:[#allocation2 + $0x48] sm:$0xff] }
 0x924   :  { %2015 = vmatprep.subr.mxu1 %v2199_v0 }
 0x925   :  { %2016 = vmatpush3.msra.mxu1 %v2393_v30  ;;  %v2131_v30 = vld [vmem:[#allocation2 + $0x40] sm:$0xff] }
 0x926   :  { %2017 = vmatprep.subr.mxu1 %v2199_v0 }
 0x927   :  { %2018 = vmatpush3.msra.mxu1 %v2397_v31  ;;  %v2132_v31 = vld [vmem:[#allocation2 + $0x38] sm:$0xff] }
 0x928   :  { %2019 = vmatprep.subr.mxu1 %v2199_v0 }
 0x929   :  { %2020 = vmatpush3.msra.mxu1 %v2401_v32  ;;  %v2133_v32 = vld [vmem:[#allocation2 + $0x30] sm:$0xff] }
 0x92a   :  { %2021 = vmatprep.subr.mxu1 %v2199_v0 }
 0x92b   :  { %2022 = vmatpush3.msra.mxu1 %v2405_v33  ;;  %v2134_v33 = vld [vmem:[#allocation2 + $0x28] sm:$0xff] }
 0x92c   :  { %2061 = vmatprep.subr.mxu1 %v2199_v0 }
 0x9cc   :  { %v955_v16 = vpop.f32.mrf.mxu1 }
 0x9cd   :  { %v2850_v17 = vadd.f32 %v2454_v39, %v955_v16 }
 0x9ce   :  { %v1955_v18 = vpop.f32.mrf.mxu1 }
 0x9cf   :  { %v959_v19 = vmul.f32 0.5, %v2850_v17  ;;  %v963_v45 = vmul.f32 3.0, %v2850_v17  ;;  %v962_v47 = vsub.f32 %v2761_v7, %v2850_v17 }
 0x9d1   :  { %v960_v20 = vadd.f32 %v959_v19, %v2688_v51  ;;  %v964_v52 = vadd.f32 %v963_v45, %v2761_v7 }
 0x9d3   :  { %v961_v21 = vsub.f32 %v960_v20, %v2764_v10 }
 0x9d5   :  { %1989 = vmatmul.mubr.f32.vlgmr.msra.gmra.mxu0 %v961_v21 }
 0x9d6   :  { %2027 = vmatpush3.msra.mxu0 %v2124_v22  ;;  %2058 = vmatprep.mubr.msk.f32.mxu0 %vm2200_vm0, %v2199_v0 }
 0x9d7   :  { %2028 = vmatprep.subr.mxu0 %v2199_v0 }
 0x9d8   :  { %2029 = vmatpush3.msra.mxu0 %v2125_v23 }
 0x9d9   :  { %2030 = vmatprep.subr.mxu0 %v2199_v0 }
 0x9da   :  { %2031 = vmatpush3.msra.mxu0 %v2126_v25 }
 0x9db   :  { %2032 = vmatprep.subr.mxu0 %v2199_v0 }
 0x9dc   :  { %2033 = vmatpush3.msra.mxu0 %v2127_v26 }
 0x9dd   :  { %2034 = vmatprep.subr.mxu0 %v2199_v0 }
 0x9de   :  { %2035 = vmatpush3.msra.mxu0 %v2128_v27 }
 0x9df   :  { %2036 = vmatprep.subr.mxu0 %v2199_v0 }
 0x9e0   :  { %2037 = vmatpush3.msra.mxu0 %v2129_v28 }
 0x9e1   :  { %2038 = vmatprep.subr.mxu0 %v2199_v0 }
 0x9e2   :  { %2039 = vmatpush3.msra.mxu0 %v2130_v29 }
 0x9e3   :  { %2040 = vmatprep.subr.mxu0 %v2199_v0 }
 0x9e4   :  { %2041 = vmatpush3.msra.mxu0 %v2131_v30 }
 0x9e5   :  { %2042 = vmatprep.subr.mxu0 %v2199_v0 }
 0x9e6   :  { %2043 = vmatpush3.msra.mxu0 %v2132_v31 }
 0x9e7   :  { %2044 = vmatprep.subr.mxu0 %v2199_v0 }
 0x9e8   :  { %2045 = vmatpush3.msra.mxu0 %v2133_v32 }
 0x9e9   :  { %2046 = vmatprep.subr.mxu0 %v2199_v0 }
 0x9ea   :  { %2047 = vmatpush3.msra.mxu0 %v2134_v33 }
 0x9eb   :  { %2048 = vmatprep.subr.mxu0 %v2199_v0 }
 0x9ec   :  { %2049 = vmatpush3.msra.mxu0 %v2135_v55 }
 0x9ed   :  { %2050 = vmatprep.subr.mxu0 %v2199_v0 }
 0x9ee   :  { %2051 = vmatpush3.msra.mxu0 %v2136_v56 }
 0x9ef   :  { %2052 = vmatprep.subr.mxu0 %v2199_v0 }
 0x9f0   :  { %2053 = vmatpush3.msra.mxu0 %v2137_v57 }
 0x9f1   :  { %2054 = vmatprep.subr.mxu0 %v2199_v0 }
 0x9f2   :  { %2055 = vmatpush3.msra.mxu0 %v2138_v58 }
 0x9f3   :  { %2056 = vmatprep.subr.mxu0 %v2199_v0 }
 0x9f4   :  { %2057 = vmatpush3.msra.mxu0 %v2139_v59 }
 0xa95   :  { %v1031_v60 = vpop.f32.mrf.mxu0 }
 0xa96   :  { %v1032_v61 = vadd.f32 %v2414_v34, %v1031_v60  ;;  %v2140_v34 = vld [vmem:[#allocation4 + $0x48] sm:$0xff] }
 0xa97   :  { %v1990_v62 = vpop.f32.mrf.mxu0 }
 0xa98   :  { %2114 = vtanh.f32 %v1032_v61 }
 0xaa5   :  { %v2115_v63 = vpop.eup %2114 }
 0xaa6   :  { %2024 = vmatmul.mubr.f32.vlgmr.msra.gmra.mxu1 %v2115_v63 }
 0xaa7   :  { %2062 = vmatpush3.msra.mxu1 %v2803_v6  ;;  %2093 = vmatprep.mubr.msk.f32.mxu1 %vm2200_vm0, %v2199_v0 }
 0xaa8   :  { %2063 = vmatprep.subr.mxu1 %v2199_v0 }
 0xaa9   :  { %2064 = vmatpush3.msra.mxu1 %v2809_v9 }
 0xaaa   :  { %2065 = vmatprep.subr.mxu1 %v2199_v0 }
 0xaab   :  { %2066 = vmatpush3.msra.mxu1 %v2813_v11 }
 0xaac   :  { %2067 = vmatprep.subr.mxu1 %v2199_v0 }
 0xaad   :  { %2068 = vmatpush3.msra.mxu1 %v2817_v13 }
 0xaae   :  { %2069 = vmatprep.subr.mxu1 %v2199_v0 }
 0xaaf   :  { %2070 = vmatpush3.msra.mxu1 %v2821_v14 }
 0xab0   :  { %2071 = vmatprep.subr.mxu1 %v2199_v0 }
 0xab1   :  { %2072 = vmatpush3.msra.mxu1 %v2825_v15 }
 0xab2   :  { %2073 = vmatprep.subr.mxu1 %v2199_v0 }
 0xab3   :  { %2074 = vmatpush3.msra.mxu1 %v2140_v34 }
 0xab4   :  { %2075 = vmatprep.subr.mxu1 %v2199_v0 }
 0xab5   :  { %2076 = vmatpush3.msra.mxu1 %v2141_v35 }
 0xab6   :  { %2077 = vmatprep.subr.mxu1 %v2199_v0 }
 0xab7   :  { %2078 = vmatpush3.msra.mxu1 %v2142_v36 }
 0xab8   :  { %2079 = vmatprep.subr.mxu1 %v2199_v0 }
 0xab9   :  { %2080 = vmatpush3.msra.mxu1 %v2143_v37 }
 0xaba   :  { %2081 = vmatprep.subr.mxu1 %v2199_v0 }
 0xabb   :  { %2082 = vmatpush3.msra.mxu1 %v2144_v38 }
 0xabc   :  { %2083 = vmatprep.subr.mxu1 %v2199_v0 }
 0xabd   :  { %2084 = vmatpush3.msra.mxu1 %v2145_v40 }
 0xabe   :  { %2085 = vmatprep.subr.mxu1 %v2199_v0 }
 0xabf   :  { %2086 = vmatpush3.msra.mxu1 %v2146_v42 }
 0xac0   :  { %2087 = vmatprep.subr.mxu1 %v2199_v0 }
 0xac1   :  { %2088 = vmatpush3.msra.mxu1 %v2147_v41 }
 0xac2   :  { %2089 = vmatprep.subr.mxu1 %v2199_v0 }
 0xac3   :  { %2090 = vmatpush3.msra.mxu1 %v2148_v43 }
 0xac4   :  { %2091 = vmatprep.subr.mxu1 %v2199_v0 }
 0xac5   :  { %2092 = vmatpush3.msra.mxu1 %v2149_v44 }
 0xb66   :  { %v1102_v46 = vpop.f32.mrf.mxu1 }
 0xb67   :  { %v1103_v48 = vadd.f32 %v2454_v39, %v1102_v46 }
 0xb68   :  { %v2025_v49 = vpop.f32.mrf.mxu1 }
 0xb69   :  { %v1106_v50 = vadd.f32 %v1103_v48, %v962_v47  ;;  %v1109_v24 = vmul.f32 3.0, %v1103_v48 }
 0xb6b   :  { %v1107_v53 = vmul.f32 0.5, %v1106_v50  ;;  %v1110_v54 = vadd.f32 %v1109_v24, %v964_v52 }
 0xb6d   :  { %v1108_v5 = vadd.f32 %v1107_v53, %v2688_v51 }
 0xb6f   :  { %2059 = vmatmul.mubr.f32.vlgmr.msra.gmra.mxu0 %v1108_v5 }
 0xc2f   :  { %v1177_v0 = vpop.f32.mrf.mxu0 }
 0xc30   :  { %v1178_v10 = vadd.f32 %v2150_v8, %v1177_v0 }
 0xc31   :  { %v2060_v12 = vpop.f32.mrf.mxu0 }
 0xc32   :  { %2116 = vtanh.f32 %v1178_v10 }
 0xc3f   :  { %v2117_v1 = vpop.eup %2116 }
 0xc40   :  { %2094 = vmatmul.mubr.f32.vlgmr.msra.gmra.mxu1 %v2117_v1 }
 0xd00   :  { %v1248_v2 = vpop.f32.mrf.mxu1 }
 0xd01   :  { %v1249_v3 = vadd.f32 %v2454_v39, %v1248_v2 }
 0xd02   :  { %v2095_v4 = vpop.f32.mrf.mxu1 }
 0xd03   :  { %v1252_v7 = vadd.f32 %v1249_v3, %v1110_v54 }
 0xd05   :  { %v1253_v6 = vmul.f32 0.0625, %v1252_v7 }
 0xd07   :  { %v1254_v9 = vadd.f32 %v1253_v6, %v2688_v51 }
 0xd09   :  { %1255 = vst [vmem:[%s2915_s5] sm:$0xff] %v1254_v9 }
 0xd0a   :  { %1260 = vsyncpa [#allocation3], 1 }
 0xd0b   :  { %1261 = vsyncpa [#allocation5], 1 }

</bundles_post_ra>
